<compile_context>
chip_gen: v5e
topology: v5e:2x2
jax: 0.10.0
libtpu: 0.0.40
codegen_flags: <defaults>
</compile_context>

<pallas_src>
import math

import jax
import jax.numpy as jnp
from jax.experimental import pallas as pl
from jax.experimental.pallas import tpu as pltpu

# ---------------- small synthetic config ----------------
VOCAB = 64      # vocab_size
HID = 32        # num_hiddens == key/query/value_size == *_in_features
FFN_HID = 64    # ffn_num_hiddens
HEADS = 2       # num_heads
LAYERS = 2      # num_layers
MAX_LEN = 16
BATCH = 2
SEQ = 8
NUM_PRED = 3
EPS = 1e-5      # torch LayerNorm default eps


def _ln(x, gamma, beta):
    """LayerNorm over the last axis (matches nn.LayerNorm, biased variance)."""
    mu = jnp.mean(x, axis=-1, keepdims=True)
    var = jnp.mean((x - mu) ** 2, axis=-1, keepdims=True)
    return (x - mu) * jax.lax.rsqrt(var + EPS) * gamma + beta


# ---------------- fused whole-model kernel (grid over encoder layers) ----------------
def bert_kernel(pos_ref,                    # scalar-prefetch: flat MLM positions (SMEM)
                x0_ref, bias_ref,
                wqkv_ref, bqkv_ref, wo_ref, bo_ref, g1_ref, be1_ref,
                w1_ref, b1_ref, w2_ref, b2_ref, g2_ref, be2_ref,
                mw1_ref, mb1_ref, mg_ref, mbe_ref, mw2_ref, mb2_ref,
                wh_ref, bh_ref, wn_ref, bn_ref,
                enc_ref, mlm_ref, nsp_ref,
                x_scr):
    l = pl.program_id(0)
    BS, H = x0_ref.shape
    HB, _, S = bias_ref.shape
    B = HB // HEADS
    dh = H // HEADS
    scale = 1.0 / math.sqrt(dh)

    @pl.when(l == 0)
    def _():
        x_scr[...] = x0_ref[...]             # load embeddings into the resident scratch

    X = x_scr[...]                           # (BS, H) f32, resident across layers
    Xb = X.astype(jnp.bfloat16)

    # ---- multi-head self-attention (heads folded into the batch dim) ----
    Q = jnp.dot(Xb, wqkv_ref[0], preferred_element_type=jnp.float32) + bqkv_ref[0]
    K = jnp.dot(Xb, wqkv_ref[1], preferred_element_type=jnp.float32) + bqkv_ref[1]
    V = jnp.dot(Xb, wqkv_ref[2], preferred_element_type=jnp.float32) + bqkv_ref[2]

    def fold_heads(t):                       # (BS, H) -> (HEADS*B, S, dh), head-major
        t3 = t.reshape(B, S, H)
        return jnp.concatenate(
            [t3[:, :, h * dh:(h + 1) * dh] for h in range(HEADS)], axis=0)

    Qh = fold_heads(Q).astype(jnp.bfloat16)
    Kh = fold_heads(K).astype(jnp.bfloat16)
    Vh = fold_heads(V).astype(jnp.bfloat16)

    s = jnp.einsum('bqd,bkd->bqk', Qh, Kh,
                   preferred_element_type=jnp.float32) * scale
    s = s + bias_ref[...]                    # additive key mask (0 / -1e6), hoisted
    s = s - jnp.max(s, axis=-1, keepdims=True)
    p = jnp.exp(s)
    p = p * pl.reciprocal(jnp.sum(p, axis=-1, keepdims=True), approx=True)
    ctx = jnp.einsum('bqk,bkd->bqd', p.astype(jnp.bfloat16), Vh,
                     preferred_element_type=jnp.float32)       # (HEADS*B, S, dh)
    # undo the head fold: concat heads along the lane dim -> (BS, H)
    ctx = jnp.concatenate(
        [ctx[h * B:(h + 1) * B].reshape(BS, dh) for h in range(HEADS)], axis=-1)
    attn = jnp.dot(ctx.astype(jnp.bfloat16), wo_ref[...],
                   preferred_element_type=jnp.float32) + bo_ref[...]

    Y1 = _ln(attn + X, g1_ref[...], be1_ref[...])              # AddNorm 1 (f32)

    # ---- position-wise FFN ----
    h1 = jax.nn.relu(jnp.dot(Y1.astype(jnp.bfloat16), w1_ref[...],
                             preferred_element_type=jnp.float32) + b1_ref[...])
    ffn = jnp.dot(h1.astype(jnp.bfloat16), w2_ref[...],
                  preferred_element_type=jnp.float32) + b2_ref[...]
    Xn = _ln(ffn + Y1, g2_ref[...], be2_ref[...])              # AddNorm 2 (f32)
    x_scr[...] = Xn                                            # carry to next layer

    # ---- heads: run once, after the last encoder layer ----
    @pl.when(l == pl.num_programs(0) - 1)
    def _():
        enc_ref[...] = Xn

        # MaskLM: gather predicted positions via scalar-prefetched flat indices.
        n_rows = mlm_ref.shape[0]
        rows = [x_scr[pl.ds(pos_ref[i], 1), :] for i in range(n_rows)]
        mX = jnp.concatenate(rows, axis=0)                     # (B*P, H)
        mh = jnp.dot(mX.astype(jnp.bfloat16), mw1_ref[...],
                     preferred_element_type=jnp.float32) + mb1_ref[...]
        mh = _ln(jax.nn.relu(mh), mg_ref[...], mbe_ref[...])
        mlm_ref[...] = jnp.dot(mh.astype(jnp.bfloat16), mw2_ref[...],
                               preferred_element_type=jnp.float32) + mb2_ref[...]

        # pooler + NextSentencePred: [CLS] rows via a static slice
        cls = Xn.reshape(B, S, H)[:, 0, :]                     # (B, H)
        pooled = jnp.tanh(jnp.dot(cls.astype(jnp.bfloat16), wh_ref[...],
                                  preferred_element_type=jnp.float32) + bh_ref[...])
        nsp_ref[...] = jnp.dot(pooled.astype(jnp.bfloat16), wn_ref[...],
                               preferred_element_type=jnp.float32) + bn_ref[...]


def bert_fused_call(flat_pos, x0, attn_bias, p):
    BS, H = x0.shape
    HB, _, S = attn_bias.shape
    B = HB // HEADS
    n_rows = flat_pos.shape[0]

    def const_spec(shape):
        n = len(shape)
        return pl.BlockSpec(shape, lambda l, pos, n=n: (0,) * n)

    def layer_spec(tail):
        m = len(tail)
        return pl.BlockSpec((None,) + tail, lambda l, pos, m=m: (l,) + (0,) * m)

    in_specs = [
        const_spec((BS, H)),              # x0 (embeddings)
        const_spec((HB, 1, S)),           # additive attention bias
        layer_spec((3, H, H)),            # wqkv (bf16)
        layer_spec((3, 1, H)),            # bqkv
        layer_spec((H, H)),               # wo (bf16)
        layer_spec((1, H)),               # bo
        layer_spec((1, H)),               # g1
        layer_spec((1, H)),               # be1
        layer_spec((H, FFN_HID)),         # w1 (bf16)
        layer_spec((1, FFN_HID)),         # b1
        layer_spec((FFN_HID, H)),         # w2 (bf16)
        layer_spec((1, H)),               # b2
        layer_spec((1, H)),               # g2
        layer_spec((1, H)),               # be2
        const_spec((H, H)),               # mlm_w1 (bf16)
        const_spec((1, H)),               # mlm_b1
        const_spec((1, H)),               # mlm_g
        const_spec((1, H)),               # mlm_be
        const_spec((H, VOCAB)),           # mlm_w2 (bf16)
        const_spec((1, VOCAB)),           # mlm_b2
        const_spec((H, H)),               # wh (bf16)
        const_spec((1, H)),               # bh
        const_spec((H, 2)),               # wn (bf16)
        const_spec((1, 2)),               # bn
    ]
    out_specs = [
        const_spec((BS, H)),              # encoded (flat)
        const_spec((n_rows, VOCAB)),      # MLM logits
        const_spec((B, 2)),               # NSP logits
    ]
    grid_spec = pltpu.PrefetchScalarGridSpec(
        num_scalar_prefetch=1,
        grid=(LAYERS,),
        in_specs=in_specs,
        out_specs=out_specs,
        scratch_shapes=[pltpu.VMEM((BS, H), jnp.float32)],   # resident activations
    )
    return pl.pallas_call(
        bert_kernel,
        out_shape=(
            jax.ShapeDtypeStruct((BS, H), jnp.float32),
            jax.ShapeDtypeStruct((n_rows, VOCAB), jnp.float32),
            jax.ShapeDtypeStruct((B, 2), jnp.float32),
        ),
        grid_spec=grid_spec,
        compiler_params=pltpu.CompilerParams(
            dimension_semantics=("arbitrary",)),   # layer axis is sequential
    )(flat_pos, x0, attn_bias,
      p['wqkv'], p['bqkv'], p['wo'], p['bo'], p['g1'], p['be1'],
      p['w1'], p['b1'], p['w2'], p['b2'], p['g2'], p['be2'],
      p['mlm_w1'], p['mlm_b1'], p['mlm_g'], p['mlm_be'], p['mlm_w2'], p['mlm_b2'],
      p['wh'], p['bh'], p['wn'], p['bn'])


# ---------------- parameters (per-layer weights stacked along LAYERS) ----------------
def init_params(key):
    ks = jax.random.split(key, 16)
    it = iter(ks)

    def nrm(shape, dtype=jnp.bfloat16):
        w = 0.02 * jax.random.normal(next(it), shape, dtype=jnp.float32)
        return w.astype(dtype)

    f32 = jnp.float32
    return dict(
        # embeddings (gathers stay in plain JAX)
        tok_emb=nrm((VOCAB, HID), f32),
        seg_emb=nrm((2, HID), f32),
        pos_emb=nrm((1, MAX_LEN, HID), f32),
        # encoder layers: MXU weights in bf16, biases / LN params in f32
        wqkv=nrm((LAYERS, 3, HID, HID)),
        bqkv=jnp.zeros((LAYERS, 3, 1, HID), f32),
        wo=nrm((LAYERS, HID, HID)), bo=jnp.zeros((LAYERS, 1, HID), f32),
        g1=jnp.ones((LAYERS, 1, HID), f32), be1=jnp.zeros((LAYERS, 1, HID), f32),
        w1=nrm((LAYERS, HID, FFN_HID)), b1=jnp.zeros((LAYERS, 1, FFN_HID), f32),
        w2=nrm((LAYERS, FFN_HID, HID)), b2=jnp.zeros((LAYERS, 1, HID), f32),
        g2=jnp.ones((LAYERS, 1, HID), f32), be2=jnp.zeros((LAYERS, 1, HID), f32),
        # MaskLM head
        mlm_w1=nrm((HID, HID)), mlm_b1=jnp.zeros((1, HID), f32),
        mlm_g=jnp.ones((1, HID), f32), mlm_be=jnp.zeros((1, HID), f32),
        mlm_w2=nrm((HID, VOCAB)), mlm_b2=jnp.zeros((1, VOCAB), f32),
        # pooler ("hidden") + NextSentencePred
        wh=nrm((HID, HID)), bh=jnp.zeros((1, HID), f32),
        wn=nrm((HID, 2)), bn=jnp.zeros((1, 2), f32),
    )


# ---------------- full BERTModel forward ----------------
def bert_forward(params, tokens, segments, valid_lens, pred_positions):
    B, S = tokens.shape
    P = pred_positions.shape[1]

    # BERTEncoder embeddings (plain-JAX glue: data-dependent gathers; dropout = eval no-op)
    X = params['tok_emb'][tokens] + params['seg_emb'][segments]
    X = X + params['pos_emb'][:, :S, :]
    x0 = X.reshape(B * S, HID).astype(jnp.float32)

    # additive key mask hoisted out of the kernel's layer loop:
    # 0 for valid keys, -1e6 for padded keys; head-major (HEADS*B, 1, S)
    valid = (jnp.arange(S, dtype=jnp.int32)[None, :]
             < valid_lens[:, None]).astype(jnp.float32)          # (B, S)
    attn_bias = jnp.tile((valid - 1.0) * 1e6, (HEADS, 1))[:, None, :]

    # flat MLM positions (scalar-prefetched into SMEM by the kernel)
    batch_idx = jnp.repeat(jnp.arange(B, dtype=jnp.int32), P)
    flat_pos = (batch_idx * S + pred_positions.reshape(-1)).astype(jnp.int32)

    enc_flat, mlm_flat, nsp_Y_hat = bert_fused_call(flat_pos, x0, attn_bias, params)
    return (enc_flat.reshape(B, S, HID),
            mlm_flat.reshape(B, P, VOCAB),
            nsp_Y_hat)


if __name__ == "__main__":
    key = jax.random.PRNGKey(0)
    kp, kt, kpp = jax.random.split(key, 3)
    params = init_params(kp)

    tokens = jax.random.randint(kt, (BATCH, SEQ), 0, VOCAB, dtype=jnp.int32)
    segments = jnp.concatenate(
        [jnp.zeros((BATCH, SEQ // 2), jnp.int32),
         jnp.ones((BATCH, SEQ // 2), jnp.int32)], axis=1)
    valid_lens = jnp.array([6, 8], dtype=jnp.int32)
    pred_positions = jax.random.randint(kpp, (BATCH, NUM_PRED), 0, SEQ, dtype=jnp.int32)

    fwd = jax.jit(bert_forward)
    encoded_X, mlm_Y_hat, nsp_Y_hat = fwd(
        params, tokens, segments, valid_lens, pred_positions)
    jax.block_until_ready((encoded_X, mlm_Y_hat, nsp_Y_hat))

    assert encoded_X.shape == (BATCH, SEQ, HID)
    assert mlm_Y_hat.shape == (BATCH, NUM_PRED, VOCAB)
    assert nsp_Y_hat.shape == (BATCH, 2)
    assert bool(jnp.all(jnp.isfinite(encoded_X)))
    assert bool(jnp.all(jnp.isfinite(mlm_Y_hat)))
    assert bool(jnp.all(jnp.isfinite(nsp_Y_hat)))
    print("KERNEL_OK")
</pallas_src>

<mosaic_0001>
module attributes {stable_mosaic.version = 11 : i64} {
  func.func @bert_kernel(%arg0: i32, %arg1: memref<6xi32, #tpu.memory_space<smem>>, %arg2: memref<16x32xf32, #tpu.memory_space<vmem>>, %arg3: memref<4x1x8xf32, #tpu.memory_space<vmem>>, %arg4: memref<1x3x32x32xbf16, #tpu.memory_space<vmem>>, %arg5: memref<1x3x1x32xf32, #tpu.memory_space<vmem>>, %arg6: memref<1x32x32xbf16, #tpu.memory_space<vmem>>, %arg7: memref<1x1x32xf32, #tpu.memory_space<vmem>>, %arg8: memref<1x1x32xf32, #tpu.memory_space<vmem>>, %arg9: memref<1x1x32xf32, #tpu.memory_space<vmem>>, %arg10: memref<1x32x64xbf16, #tpu.memory_space<vmem>>, %arg11: memref<1x1x64xf32, #tpu.memory_space<vmem>>, %arg12: memref<1x64x32xbf16, #tpu.memory_space<vmem>>, %arg13: memref<1x1x32xf32, #tpu.memory_space<vmem>>, %arg14: memref<1x1x32xf32, #tpu.memory_space<vmem>>, %arg15: memref<1x1x32xf32, #tpu.memory_space<vmem>>, %arg16: memref<32x32xbf16, #tpu.memory_space<vmem>>, %arg17: memref<1x32xf32, #tpu.memory_space<vmem>>, %arg18: memref<1x32xf32, #tpu.memory_space<vmem>>, %arg19: memref<1x32xf32, #tpu.memory_space<vmem>>, %arg20: memref<32x64xbf16, #tpu.memory_space<vmem>>, %arg21: memref<1x64xf32, #tpu.memory_space<vmem>>, %arg22: memref<32x32xbf16, #tpu.memory_space<vmem>>, %arg23: memref<1x32xf32, #tpu.memory_space<vmem>>, %arg24: memref<32x2xbf16, #tpu.memory_space<vmem>>, %arg25: memref<1x2xf32, #tpu.memory_space<vmem>>, %arg26: memref<16x32xf32, #tpu.memory_space<vmem>>, %arg27: memref<6x64xf32, #tpu.memory_space<vmem>>, %arg28: memref<2x2xf32, #tpu.memory_space<vmem>>, %arg29: memref<16x32xf32, #tpu.memory_space<vmem>>) attributes {dimension_semantics = [#tpu.dimension_semantics<arbitrary>], iteration_bounds = array<i64: 2>, scalar_prefetch = 1 : i64, scratch_operands = 1 : i64, tpu.core_type = #tpu.core_type<tc>, window_params = [{pipeline_mode = #tpu.pipeline_mode<synchronous>, transform_indices = @transform_0, window_bounds = array<i64: 16, 32>}, {pipeline_mode = #tpu.pipeline_mode<synchronous>, transform_indices = @transform_1, window_bounds = array<i64: 4, 1, 8>}, {transform_indices = @transform_2, window_bounds = array<i64: 1, 3, 32, 32>}, {transform_indices = @transform_3, window_bounds = array<i64: 1, 3, 1, 32>}, {transform_indices = @transform_4, window_bounds = array<i64: 1, 32, 32>}, {transform_indices = @transform_5, window_bounds = array<i64: 1, 1, 32>}, {transform_indices = @transform_6, window_bounds = array<i64: 1, 1, 32>}, {transform_indices = @transform_7, window_bounds = array<i64: 1, 1, 32>}, {transform_indices = @transform_8, window_bounds = array<i64: 1, 32, 64>}, {transform_indices = @transform_9, window_bounds = array<i64: 1, 1, 64>}, {transform_indices = @transform_10, window_bounds = array<i64: 1, 64, 32>}, {transform_indices = @transform_11, window_bounds = array<i64: 1, 1, 32>}, {transform_indices = @transform_12, window_bounds = array<i64: 1, 1, 32>}, {transform_indices = @transform_13, window_bounds = array<i64: 1, 1, 32>}, {pipeline_mode = #tpu.pipeline_mode<synchronous>, transform_indices = @transform_14, window_bounds = array<i64: 32, 32>}, {pipeline_mode = #tpu.pipeline_mode<synchronous>, transform_indices = @transform_15, window_bounds = array<i64: 1, 32>}, {pipeline_mode = #tpu.pipeline_mode<synchronous>, transform_indices = @transform_16, window_bounds = array<i64: 1, 32>}, {pipeline_mode = #tpu.pipeline_mode<synchronous>, transform_indices = @transform_17, window_bounds = array<i64: 1, 32>}, {pipeline_mode = #tpu.pipeline_mode<synchronous>, transform_indices = @transform_18, window_bounds = array<i64: 32, 64>}, {pipeline_mode = #tpu.pipeline_mode<synchronous>, transform_indices = @transform_19, window_bounds = array<i64: 1, 64>}, {pipeline_mode = #tpu.pipeline_mode<synchronous>, transform_indices = @transform_20, window_bounds = array<i64: 32, 32>}, {pipeline_mode = #tpu.pipeline_mode<synchronous>, transform_indices = @transform_21, window_bounds = array<i64: 1, 32>}, {pipeline_mode = #tpu.pipeline_mode<synchronous>, transform_indices = @transform_22, window_bounds = array<i64: 32, 2>}, {pipeline_mode = #tpu.pipeline_mode<synchronous>, transform_indices = @transform_23, window_bounds = array<i64: 1, 2>}, {pipeline_mode = #tpu.pipeline_mode<synchronous>, transform_indices = @transform_24, window_bounds = array<i64: 16, 32>}, {pipeline_mode = #tpu.pipeline_mode<synchronous>, transform_indices = @transform_25, window_bounds = array<i64: 6, 64>}, {pipeline_mode = #tpu.pipeline_mode<synchronous>, transform_indices = @transform_26, window_bounds = array<i64: 2, 2>}]} {
    %c0_i32 = arith.constant 0 : i32
    %0 = arith.cmpi eq, %arg0, %c0_i32 : i32
    %1 = arith.extui %0 : i1 to i32
    %c0_i32_0 = arith.constant 0 : i32
    %2 = arith.cmpi ne, %1, %c0_i32_0 : i32
    scf.if %2 {
      %c0_81 = arith.constant 0 : index
      %c0_82 = arith.constant 0 : index
      %148 = vector.load %arg2[%c0_81, %c0_82] : memref<16x32xf32, #tpu.memory_space<vmem>>, vector<16x32xf32>
      %c0_83 = arith.constant 0 : index
      %c0_84 = arith.constant 0 : index
      %149 = vector.load %arg29[%c0_83, %c0_84] : memref<16x32xf32, #tpu.memory_space<vmem>>, vector<16x32xf32>
      tpu.vector_store %arg29[%c0_83, %c0_84], %148 {strides = array<i32>} : memref<16x32xf32, #tpu.memory_space<vmem>>, vector<16x32xf32>,
    } else {
    }
    %c0 = arith.constant 0 : index
    %c0_1 = arith.constant 0 : index
    %3 = vector.load %arg29[%c0, %c0_1] : memref<16x32xf32, #tpu.memory_space<vmem>>, vector<16x32xf32>
    %4 = arith.truncf %3 : vector<16x32xf32> to vector<16x32xbf16>
    %c0_2 = arith.constant 0 : index
    %c0_3 = arith.constant 0 : index
    %c0_4 = arith.constant 0 : index
    %c0_5 = arith.constant 0 : index
    %5 = vector.load %arg4[%c0_2, %c0_3, %c0_4, %c0_5] : memref<1x3x32x32xbf16, #tpu.memory_space<vmem>>, vector<1x1x32x32xbf16>
    %6 = vector.shape_cast %5 : vector<1x1x32x32xbf16> to vector<32x32xbf16>
    %cst = arith.constant dense<0.000000e+00> : vector<16x32xf32>
    %7 = tpu.matmul %4, %6, %cst {dimension_numbers = #tpu.dot_dimension_numbers<[1], [0], [0], [1], [0, 0, 1, 1], [], []>} : vector<16x32xbf16>, vector<32x32xbf16>, vector<16x32xf32> -> vector<16x32xf32>
    %c0_6 = arith.constant 0 : index
    %c0_7 = arith.constant 0 : index
    %c0_8 = arith.constant 0 : index
    %c0_9 = arith.constant 0 : index
    %8 = vector.load %arg5[%c0_6, %c0_7, %c0_8, %c0_9] : memref<1x3x1x32xf32, #tpu.memory_space<vmem>>, vector<1x1x1x32xf32>
    %9 = vector.shape_cast %8 : vector<1x1x1x32xf32> to vector<1x32xf32>
    %10 = vector.broadcast %9 : vector<1x32xf32> to vector<16x32xf32>
    %11 = arith.addf %7, %10 : vector<16x32xf32>
    %c0_10 = arith.constant 0 : index
    %c1 = arith.constant 1 : index
    %c0_11 = arith.constant 0 : index
    %c0_12 = arith.constant 0 : index
    %12 = vector.load %arg4[%c0_10, %c1, %c0_11, %c0_12] : memref<1x3x32x32xbf16, #tpu.memory_space<vmem>>, vector<1x1x32x32xbf16>
    %13 = vector.shape_cast %12 : vector<1x1x32x32xbf16> to vector<32x32xbf16>
    %cst_13 = arith.constant dense<0.000000e+00> : vector<16x32xf32>
    %14 = tpu.matmul %4, %13, %cst_13 {dimension_numbers = #tpu.dot_dimension_numbers<[1], [0], [0], [1], [0, 0, 1, 1], [], []>} : vector<16x32xbf16>, vector<32x32xbf16>, vector<16x32xf32> -> vector<16x32xf32>
    %c0_14 = arith.constant 0 : index
    %c1_15 = arith.constant 1 : index
    %c0_16 = arith.constant 0 : index
    %c0_17 = arith.constant 0 : index
    %15 = vector.load %arg5[%c0_14, %c1_15, %c0_16, %c0_17] : memref<1x3x1x32xf32, #tpu.memory_space<vmem>>, vector<1x1x1x32xf32>
    %16 = vector.shape_cast %15 : vector<1x1x1x32xf32> to vector<1x32xf32>
    %17 = vector.broadcast %16 : vector<1x32xf32> to vector<16x32xf32>
    %18 = arith.addf %14, %17 : vector<16x32xf32>
    %c0_18 = arith.constant 0 : index
    %c2 = arith.constant 2 : index
    %c0_19 = arith.constant 0 : index
    %c0_20 = arith.constant 0 : index
    %19 = vector.load %arg4[%c0_18, %c2, %c0_19, %c0_20] : memref<1x3x32x32xbf16, #tpu.memory_space<vmem>>, vector<1x1x32x32xbf16>
    %20 = vector.shape_cast %19 : vector<1x1x32x32xbf16> to vector<32x32xbf16>
    %cst_21 = arith.constant dense<0.000000e+00> : vector<16x32xf32>
    %21 = tpu.matmul %4, %20, %cst_21 {dimension_numbers = #tpu.dot_dimension_numbers<[1], [0], [0], [1], [0, 0, 1, 1], [], []>} : vector<16x32xbf16>, vector<32x32xbf16>, vector<16x32xf32> -> vector<16x32xf32>
    %c0_22 = arith.constant 0 : index
    %c2_23 = arith.constant 2 : index
    %c0_24 = arith.constant 0 : index
    %c0_25 = arith.constant 0 : index
    %22 = vector.load %arg5[%c0_22, %c2_23, %c0_24, %c0_25] : memref<1x3x1x32xf32, #tpu.memory_space<vmem>>, vector<1x1x1x32xf32>
    %23 = vector.shape_cast %22 : vector<1x1x1x32xf32> to vector<1x32xf32>
    %24 = vector.broadcast %23 : vector<1x32xf32> to vector<16x32xf32>
    %25 = arith.addf %21, %24 : vector<16x32xf32>
    %26 = vector.shape_cast %11 : vector<16x32xf32> to vector<2x8x32xf32>
    %27 = vector.extract_strided_slice %26 {offsets = [0, 0, 0], sizes = [2, 8, 16], strides = [1, 1, 1]} : vector<2x8x32xf32> to vector<2x8x16xf32>
    %28 = vector.extract_strided_slice %26 {offsets = [0, 0, 16], sizes = [2, 8, 16], strides = [1, 1, 1]} : vector<2x8x32xf32> to vector<2x8x16xf32>
    %29 = tpu.concatenate %27, %28 in 0 : vector<2x8x16xf32>, vector<2x8x16xf32> -> vector<4x8x16xf32>
    %30 = arith.truncf %29 : vector<4x8x16xf32> to vector<4x8x16xbf16>
    %31 = vector.shape_cast %18 : vector<16x32xf32> to vector<2x8x32xf32>
    %32 = vector.extract_strided_slice %31 {offsets = [0, 0, 0], sizes = [2, 8, 16], strides = [1, 1, 1]} : vector<2x8x32xf32> to vector<2x8x16xf32>
    %33 = vector.extract_strided_slice %31 {offsets = [0, 0, 16], sizes = [2, 8, 16], strides = [1, 1, 1]} : vector<2x8x32xf32> to vector<2x8x16xf32>
    %34 = tpu.concatenate %32, %33 in 0 : vector<2x8x16xf32>, vector<2x8x16xf32> -> vector<4x8x16xf32>
    %35 = arith.truncf %34 : vector<4x8x16xf32> to vector<4x8x16xbf16>
    %36 = vector.shape_cast %25 : vector<16x32xf32> to vector<2x8x32xf32>
    %37 = vector.extract_strided_slice %36 {offsets = [0, 0, 0], sizes = [2, 8, 16], strides = [1, 1, 1]} : vector<2x8x32xf32> to vector<2x8x16xf32>
    %38 = vector.extract_strided_slice %36 {offsets = [0, 0, 16], sizes = [2, 8, 16], strides = [1, 1, 1]} : vector<2x8x32xf32> to vector<2x8x16xf32>
    %39 = tpu.concatenate %37, %38 in 0 : vector<2x8x16xf32>, vector<2x8x16xf32> -> vector<4x8x16xf32>
    %40 = arith.truncf %39 : vector<4x8x16xf32> to vector<4x8x16xbf16>
    "tpu.trace_start"() <{level = 10 : i32, message = "bqd,bkd->bqk"}> : () -> ()
    %cst_26 = arith.constant dense<0.000000e+00> : vector<4x8x8xf32>
    %41 = tpu.matmul %30, %35, %cst_26 {dimension_numbers = #tpu.dot_dimension_numbers<[2], [2], [1], [1], [0, 0, 0, 1, 1, 1], [0], [0]>} : vector<4x8x16xbf16>, vector<4x8x16xbf16>, vector<4x8x8xf32> -> vector<4x8x8xf32>
    "tpu.trace_stop"() : () -> ()
    %cst_27 = arith.constant 2.500000e-01 : f32
    %42 = vector.broadcast %cst_27 : f32 to vector<4x8x8xf32>
    %43 = arith.mulf %41, %42 : vector<4x8x8xf32>
    %c0_28 = arith.constant 0 : index
    %c0_29 = arith.constant 0 : index
    %c0_30 = arith.constant 0 : index
    %44 = vector.load %arg3[%c0_28, %c0_29, %c0_30] : memref<4x1x8xf32, #tpu.memory_space<vmem>>, vector<4x1x8xf32>
    %45 = vector.broadcast %44 : vector<4x1x8xf32> to vector<4x8x8xf32>
    %46 = arith.addf %43, %45 : vector<4x8x8xf32>
    %cst_31 = arith.constant dense<0xFF800000> : vector<4x8xf32>
    %47 = vector.multi_reduction <maximumf>, %46, %cst_31 [2] : vector<4x8x8xf32> to vector<4x8xf32>
    %48 = vector.shape_cast %47 : vector<4x8xf32> to vector<4x8x1xf32>
    %49 = vector.broadcast %48 : vector<4x8x1xf32> to vector<4x8x8xf32>
    %50 = arith.subf %46, %49 : vector<4x8x8xf32>
    %51 = math.exp %50 : vector<4x8x8xf32>
    %cst_32 = arith.constant dense<0.000000e+00> : vector<4x8xf32>
    %52 = vector.multi_reduction <add>, %51, %cst_32 [2] : vector<4x8x8xf32> to vector<4x8xf32>
    %53 = vector.shape_cast %52 : vector<4x8xf32> to vector<4x8x1xf32>
    %54 = tpu.reciprocal %53 {approx = true} : vector<4x8x1xf32> -> vector<4x8x1xf32>
    %55 = vector.broadcast %54 : vector<4x8x1xf32> to vector<4x8x8xf32>
    %56 = arith.mulf %51, %55 : vector<4x8x8xf32>
    %57 = arith.truncf %56 : vector<4x8x8xf32> to vector<4x8x8xbf16>
    "tpu.trace_start"() <{level = 10 : i32, message = "bqk,bkd->bqd"}> : () -> ()
    %cst_33 = arith.constant dense<0.000000e+00> : vector<4x8x16xf32>
    %58 = tpu.matmul %57, %40, %cst_33 {dimension_numbers = #tpu.dot_dimension_numbers<[2], [1], [1], [2], [0, 0, 0, 1, 1, 2], [0], [0]>} : vector<4x8x8xbf16>, vector<4x8x16xbf16>, vector<4x8x16xf32> -> vector<4x8x16xf32>
    "tpu.trace_stop"() : () -> ()
    %59 = vector.extract_strided_slice %58 {offsets = [0, 0, 0], sizes = [2, 8, 16], strides = [1, 1, 1]} : vector<4x8x16xf32> to vector<2x8x16xf32>
    %60 = vector.shape_cast %59 : vector<2x8x16xf32> to vector<16x16xf32>
    %61 = vector.extract_strided_slice %58 {offsets = [2, 0, 0], sizes = [2, 8, 16], strides = [1, 1, 1]} : vector<4x8x16xf32> to vector<2x8x16xf32>
    %62 = vector.shape_cast %61 : vector<2x8x16xf32> to vector<16x16xf32>
    %63 = tpu.concatenate %60, %62 in 1 : vector<16x16xf32>, vector<16x16xf32> -> vector<16x32xf32>
    %64 = arith.truncf %63 : vector<16x32xf32> to vector<16x32xbf16>
    %c0_34 = arith.constant 0 : index
    %c0_35 = arith.constant 0 : index
    %c0_36 = arith.constant 0 : index
    %65 = vector.load %arg6[%c0_34, %c0_35, %c0_36] : memref<1x32x32xbf16, #tpu.memory_space<vmem>>, vector<1x32x32xbf16>
    %66 = vector.shape_cast %65 : vector<1x32x32xbf16> to vector<32x32xbf16>
    %cst_37 = arith.constant dense<0.000000e+00> : vector<16x32xf32>
    %67 = tpu.matmul %64, %66, %cst_37 {dimension_numbers = #tpu.dot_dimension_numbers<[1], [0], [0], [1], [0, 0, 1, 1], [], []>} : vector<16x32xbf16>, vector<32x32xbf16>, vector<16x32xf32> -> vector<16x32xf32>
    %c0_38 = arith.constant 0 : index
    %c0_39 = arith.constant 0 : index
    %c0_40 = arith.constant 0 : index
    %68 = vector.load %arg7[%c0_38, %c0_39, %c0_40] : memref<1x1x32xf32, #tpu.memory_space<vmem>>, vector<1x1x32xf32>
    %69 = vector.shape_cast %68 : vector<1x1x32xf32> to vector<1x32xf32>
    %70 = vector.broadcast %69 : vector<1x32xf32> to vector<16x32xf32>
    %71 = arith.addf %67, %70 : vector<16x32xf32>
    %72 = arith.addf %71, %3 : vector<16x32xf32>
    %c0_41 = arith.constant 0 : index
    %c0_42 = arith.constant 0 : index
    %c0_43 = arith.constant 0 : index
    %73 = vector.load %arg8[%c0_41, %c0_42, %c0_43] : memref<1x1x32xf32, #tpu.memory_space<vmem>>, vector<1x1x32xf32>
    %74 = vector.shape_cast %73 : vector<1x1x32xf32> to vector<1x32xf32>
    %c0_44 = arith.constant 0 : index
    %c0_45 = arith.constant 0 : index
    %c0_46 = arith.constant 0 : index
    %75 = vector.load %arg9[%c0_44, %c0_45, %c0_46] : memref<1x1x32xf32, #tpu.memory_space<vmem>>, vector<1x1x32xf32>
    %76 = vector.shape_cast %75 : vector<1x1x32xf32> to vector<1x32xf32>
    %cst_47 = arith.constant dense<0.000000e+00> : vector<16xf32>
    %77 = vector.multi_reduction <add>, %72, %cst_47 [1] : vector<16x32xf32> to vector<16xf32>
    %78 = vector.shape_cast %77 : vector<16xf32> to vector<16x1xf32>
    %cst_48 = arith.constant 3.200000e+01 : f32
    %79 = vector.broadcast %cst_48 : f32 to vector<16x1xf32>
    %80 = arith.divf %78, %79 : vector<16x1xf32>
    %81 = vector.broadcast %80 : vector<16x1xf32> to vector<16x32xf32>
    %82 = arith.subf %72, %81 : vector<16x32xf32>
    %83 = arith.mulf %82, %82 : vector<16x32xf32>
    %cst_49 = arith.constant dense<0.000000e+00> : vector<16xf32>
    %84 = vector.multi_reduction <add>, %83, %cst_49 [1] : vector<16x32xf32> to vector<16xf32>
    %85 = vector.shape_cast %84 : vector<16xf32> to vector<16x1xf32>
    %cst_50 = arith.constant 3.200000e+01 : f32
    %86 = vector.broadcast %cst_50 : f32 to vector<16x1xf32>
    %87 = arith.divf %85, %86 : vector<16x1xf32>
    %88 = vector.broadcast %80 : vector<16x1xf32> to vector<16x32xf32>
    %89 = arith.subf %72, %88 : vector<16x32xf32>
    %cst_51 = arith.constant 9.99999974E-6 : f32
    %90 = vector.broadcast %cst_51 : f32 to vector<16x1xf32>
    %91 = arith.addf %87, %90 : vector<16x1xf32>
    %92 = math.rsqrt %91 : vector<16x1xf32>
    %93 = vector.broadcast %92 : vector<16x1xf32> to vector<16x32xf32>
    %94 = arith.mulf %89, %93 : vector<16x32xf32>
    %95 = vector.broadcast %74 : vector<1x32xf32> to vector<16x32xf32>
    %96 = arith.mulf %94, %95 : vector<16x32xf32>
    %97 = vector.broadcast %76 : vector<1x32xf32> to vector<16x32xf32>
    %98 = arith.addf %96, %97 : vector<16x32xf32>
    %99 = arith.truncf %98 : vector<16x32xf32> to vector<16x32xbf16>
    %c0_52 = arith.constant 0 : index
    %c0_53 = arith.constant 0 : index
    %c0_54 = arith.constant 0 : index
    %100 = vector.load %arg10[%c0_52, %c0_53, %c0_54] : memref<1x32x64xbf16, #tpu.memory_space<vmem>>, vector<1x32x64xbf16>
    %101 = vector.shape_cast %100 : vector<1x32x64xbf16> to vector<32x64xbf16>
    %cst_55 = arith.constant dense<0.000000e+00> : vector<16x64xf32>
    %102 = tpu.matmul %99, %101, %cst_55 {dimension_numbers = #tpu.dot_dimension_numbers<[1], [0], [0], [1], [0, 0, 1, 1], [], []>} : vector<16x32xbf16>, vector<32x64xbf16>, vector<16x64xf32> -> vector<16x64xf32>
    %c0_56 = arith.constant 0 : index
    %c0_57 = arith.constant 0 : index
    %c0_58 = arith.constant 0 : index
    %103 = vector.load %arg11[%c0_56, %c0_57, %c0_58] : memref<1x1x64xf32, #tpu.memory_space<vmem>>, vector<1x1x64xf32>
    %104 = vector.shape_cast %103 : vector<1x1x64xf32> to vector<1x64xf32>
    %105 = vector.broadcast %104 : vector<1x64xf32> to vector<16x64xf32>
    %106 = arith.addf %102, %105 : vector<16x64xf32>
    %cst_59 = arith.constant 0.000000e+00 : f32
    %107 = vector.broadcast %cst_59 : f32 to vector<16x64xf32>
    %108 = arith.maximumf %106, %107 : vector<16x64xf32>
    %109 = arith.truncf %108 : vector<16x64xf32> to vector<16x64xbf16>
    %c0_60 = arith.constant 0 : index
    %c0_61 = arith.constant 0 : index
    %c0_62 = arith.constant 0 : index
    %110 = vector.load %arg12[%c0_60, %c0_61, %c0_62] : memref<1x64x32xbf16, #tpu.memory_space<vmem>>, vector<1x64x32xbf16>
    %111 = vector.shape_cast %110 : vector<1x64x32xbf16> to vector<64x32xbf16>
    %cst_63 = arith.constant dense<0.000000e+00> : vector<16x32xf32>
    %112 = tpu.matmul %109, %111, %cst_63 {dimension_numbers = #tpu.dot_dimension_numbers<[1], [0], [0], [1], [0, 0, 1, 1], [], []>} : vector<16x64xbf16>, vector<64x32xbf16>, vector<16x32xf32> -> vector<16x32xf32>
    %c0_64 = arith.constant 0 : index
    %c0_65 = arith.constant 0 : index
    %c0_66 = arith.constant 0 : index
    %113 = vector.load %arg13[%c0_64, %c0_65, %c0_66] : memref<1x1x32xf32, #tpu.memory_space<vmem>>, vector<1x1x32xf32>
    %114 = vector.shape_cast %113 : vector<1x1x32xf32> to vector<1x32xf32>
    %115 = vector.broadcast %114 : vector<1x32xf32> to vector<16x32xf32>
    %116 = arith.addf %112, %115 : vector<16x32xf32>
    %117 = arith.addf %116, %98 : vector<16x32xf32>
    %c0_67 = arith.constant 0 : index
    %c0_68 = arith.constant 0 : index
    %c0_69 = arith.constant 0 : index
    %118 = vector.load %arg14[%c0_67, %c0_68, %c0_69] : memref<1x1x32xf32, #tpu.memory_space<vmem>>, vector<1x1x32xf32>
    %119 = vector.shape_cast %118 : vector<1x1x32xf32> to vector<1x32xf32>
    %c0_70 = arith.constant 0 : index
    %c0_71 = arith.constant 0 : index
    %c0_72 = arith.constant 0 : index
    %120 = vector.load %arg15[%c0_70, %c0_71, %c0_72] : memref<1x1x32xf32, #tpu.memory_space<vmem>>, vector<1x1x32xf32>
    %121 = vector.shape_cast %120 : vector<1x1x32xf32> to vector<1x32xf32>
    %cst_73 = arith.constant dense<0.000000e+00> : vector<16xf32>
    %122 = vector.multi_reduction <add>, %117, %cst_73 [1] : vector<16x32xf32> to vector<16xf32>
    %123 = vector.shape_cast %122 : vector<16xf32> to vector<16x1xf32>
    %cst_74 = arith.constant 3.200000e+01 : f32
    %124 = vector.broadcast %cst_74 : f32 to vector<16x1xf32>
    %125 = arith.divf %123, %124 : vector<16x1xf32>
    %126 = vector.broadcast %125 : vector<16x1xf32> to vector<16x32xf32>
    %127 = arith.subf %117, %126 : vector<16x32xf32>
    %128 = arith.mulf %127, %127 : vector<16x32xf32>
    %cst_75 = arith.constant dense<0.000000e+00> : vector<16xf32>
    %129 = vector.multi_reduction <add>, %128, %cst_75 [1] : vector<16x32xf32> to vector<16xf32>
    %130 = vector.shape_cast %129 : vector<16xf32> to vector<16x1xf32>
    %cst_76 = arith.constant 3.200000e+01 : f32
    %131 = vector.broadcast %cst_76 : f32 to vector<16x1xf32>
    %132 = arith.divf %130, %131 : vector<16x1xf32>
    %133 = vector.broadcast %125 : vector<16x1xf32> to vector<16x32xf32>
    %134 = arith.subf %117, %133 : vector<16x32xf32>
    %cst_77 = arith.constant 9.99999974E-6 : f32
    %135 = vector.broadcast %cst_77 : f32 to vector<16x1xf32>
    %136 = arith.addf %132, %135 : vector<16x1xf32>
    %137 = math.rsqrt %136 : vector<16x1xf32>
    %138 = vector.broadcast %137 : vector<16x1xf32> to vector<16x32xf32>
    %139 = arith.mulf %134, %138 : vector<16x32xf32>
    %140 = vector.broadcast %119 : vector<1x32xf32> to vector<16x32xf32>
    %141 = arith.mulf %139, %140 : vector<16x32xf32>
    %142 = vector.broadcast %121 : vector<1x32xf32> to vector<16x32xf32>
    %143 = arith.addf %141, %142 : vector<16x32xf32>
    %c0_78 = arith.constant 0 : index
    %c0_79 = arith.constant 0 : index
    %144 = vector.load %arg29[%c0_78, %c0_79] : memref<16x32xf32, #tpu.memory_space<vmem>>, vector<16x32xf32>
    tpu.vector_store %arg29[%c0_78, %c0_79], %143 {strides = array<i32>} : memref<16x32xf32, #tpu.memory_space<vmem>>, vector<16x32xf32>,
    %c1_i32 = arith.constant 1 : i32
    %145 = arith.cmpi eq, %arg0, %c1_i32 : i32
    %146 = arith.extui %145 : i1 to i32
    %c0_i32_80 = arith.constant 0 : i32
    %147 = arith.cmpi ne, %146, %c0_i32_80 : i32
    scf.if %147 {
      %c0_81 = arith.constant 0 : index
      %c0_82 = arith.constant 0 : index
      %148 = vector.load %arg26[%c0_81, %c0_82] : memref<16x32xf32, #tpu.memory_space<vmem>>, vector<16x32xf32>
      tpu.vector_store %arg26[%c0_81, %c0_82], %143 {strides = array<i32>} : memref<16x32xf32, #tpu.memory_space<vmem>>, vector<16x32xf32>,
      %c0_83 = arith.constant 0 : index
      %149 = memref.load %arg1[%c0_83] : memref<6xi32, #tpu.memory_space<smem>>
      %150 = arith.index_cast %149 : i32 to index
      %c0_84 = arith.constant 0 : index
      %151 = vector.load %arg29[%150, %c0_84] : memref<16x32xf32, #tpu.memory_space<vmem>>, vector<1x32xf32>
      %c1_85 = arith.constant 1 : index
      %152 = memref.load %arg1[%c1_85] : memref<6xi32, #tpu.memory_space<smem>>
      %153 = arith.index_cast %152 : i32 to index
      %c0_86 = arith.constant 0 : index
      %154 = vector.load %arg29[%153, %c0_86] : memref<16x32xf32, #tpu.memory_space<vmem>>, vector<1x32xf32>
      %c2_87 = arith.constant 2 : index
      %155 = memref.load %arg1[%c2_87] : memref<6xi32, #tpu.memory_space<smem>>
      %156 = arith.index_cast %155 : i32 to index
      %c0_88 = arith.constant 0 : index
      %157 = vector.load %arg29[%156, %c0_88] : memref<16x32xf32, #tpu.memory_space<vmem>>, vector<1x32xf32>
      %c3 = arith.constant 3 : index
      %158 = memref.load %arg1[%c3] : memref<6xi32, #tpu.memory_space<smem>>
      %159 = arith.index_cast %158 : i32 to index
      %c0_89 = arith.constant 0 : index
      %160 = vector.load %arg29[%159, %c0_89] : memref<16x32xf32, #tpu.memory_space<vmem>>, vector<1x32xf32>
      %c4 = arith.constant 4 : index
      %161 = memref.load %arg1[%c4] : memref<6xi32, #tpu.memory_space<smem>>
      %162 = arith.index_cast %161 : i32 to index
      %c0_90 = arith.constant 0 : index
      %163 = vector.load %arg29[%162, %c0_90] : memref<16x32xf32, #tpu.memory_space<vmem>>, vector<1x32xf32>
      %c5 = arith.constant 5 : index
      %164 = memref.load %arg1[%c5] : memref<6xi32, #tpu.memory_space<smem>>
      %165 = arith.index_cast %164 : i32 to index
      %c0_91 = arith.constant 0 : index
      %166 = vector.load %arg29[%165, %c0_91] : memref<16x32xf32, #tpu.memory_space<vmem>>, vector<1x32xf32>
      %167 = tpu.concatenate %151, %154, %157, %160, %163, %166 in 0 : vector<1x32xf32>, vector<1x32xf32>, vector<1x32xf32>, vector<1x32xf32>, vector<1x32xf32>, vector<1x32xf32> -> vector<6x32xf32>
      %168 = arith.truncf %167 : vector<6x32xf32> to vector<6x32xbf16>
      %c0_92 = arith.constant 0 : index
      %c0_93 = arith.constant 0 : index
      %169 = vector.load %arg16[%c0_92, %c0_93] : memref<32x32xbf16, #tpu.memory_space<vmem>>, vector<32x32xbf16>
      %cst_94 = arith.constant dense<0.000000e+00> : vector<6x32xf32>
      %170 = tpu.matmul %168, %169, %cst_94 {dimension_numbers = #tpu.dot_dimension_numbers<[1], [0], [0], [1], [0, 0, 1, 1], [], []>} : vector<6x32xbf16>, vector<32x32xbf16>, vector<6x32xf32> -> vector<6x32xf32>
      %c0_95 = arith.constant 0 : index
      %c0_96 = arith.constant 0 : index
      %171 = vector.load %arg17[%c0_95, %c0_96] : memref<1x32xf32, #tpu.memory_space<vmem>>, vector<1x32xf32>
      %172 = vector.broadcast %171 : vector<1x32xf32> to vector<6x32xf32>
      %173 = arith.addf %170, %172 : vector<6x32xf32>
      %cst_97 = arith.constant 0.000000e+00 : f32
      %174 = vector.broadcast %cst_97 : f32 to vector<6x32xf32>
      %175 = arith.maximumf %173, %174 : vector<6x32xf32>
      %c0_98 = arith.constant 0 : index
      %c0_99 = arith.constant 0 : index
      %176 = vector.load %arg18[%c0_98, %c0_99] : memref<1x32xf32, #tpu.memory_space<vmem>>, vector<1x32xf32>
      %c0_100 = arith.constant 0 : index
      %c0_101 = arith.constant 0 : index
      %177 = vector.load %arg19[%c0_100, %c0_101] : memref<1x32xf32, #tpu.memory_space<vmem>>, vector<1x32xf32>
      %cst_102 = arith.constant dense<0.000000e+00> : vector<6xf32>
      %178 = vector.multi_reduction <add>, %175, %cst_102 [1] : vector<6x32xf32> to vector<6xf32>
      %179 = vector.shape_cast %178 : vector<6xf32> to vector<6x1xf32>
      %cst_103 = arith.constant 3.200000e+01 : f32
      %180 = vector.broadcast %cst_103 : f32 to vector<6x1xf32>
      %181 = arith.divf %179, %180 : vector<6x1xf32>
      %182 = vector.broadcast %181 : vector<6x1xf32> to vector<6x32xf32>
      %183 = arith.subf %175, %182 : vector<6x32xf32>
      %184 = arith.mulf %183, %183 : vector<6x32xf32>
      %cst_104 = arith.constant dense<0.000000e+00> : vector<6xf32>
      %185 = vector.multi_reduction <add>, %184, %cst_104 [1] : vector<6x32xf32> to vector<6xf32>
      %186 = vector.shape_cast %185 : vector<6xf32> to vector<6x1xf32>
      %cst_105 = arith.constant 3.200000e+01 : f32
      %187 = vector.broadcast %cst_105 : f32 to vector<6x1xf32>
      %188 = arith.divf %186, %187 : vector<6x1xf32>
      %189 = vector.broadcast %181 : vector<6x1xf32> to vector<6x32xf32>
      %190 = arith.subf %175, %189 : vector<6x32xf32>
      %cst_106 = arith.constant 9.99999974E-6 : f32
      %191 = vector.broadcast %cst_106 : f32 to vector<6x1xf32>
      %192 = arith.addf %188, %191 : vector<6x1xf32>
      %193 = math.rsqrt %192 : vector<6x1xf32>
      %194 = vector.broadcast %193 : vector<6x1xf32> to vector<6x32xf32>
      %195 = arith.mulf %190, %194 : vector<6x32xf32>
      %196 = vector.broadcast %176 : vector<1x32xf32> to vector<6x32xf32>
      %197 = arith.mulf %195, %196 : vector<6x32xf32>
      %198 = vector.broadcast %177 : vector<1x32xf32> to vector<6x32xf32>
      %199 = arith.addf %197, %198 : vector<6x32xf32>
      %200 = arith.truncf %199 : vector<6x32xf32> to vector<6x32xbf16>
      %c0_107 = arith.constant 0 : index
      %c0_108 = arith.constant 0 : index
      %201 = vector.load %arg20[%c0_107, %c0_108] : memref<32x64xbf16, #tpu.memory_space<vmem>>, vector<32x64xbf16>
      %cst_109 = arith.constant dense<0.000000e+00> : vector<6x64xf32>
      %202 = tpu.matmul %200, %201, %cst_109 {dimension_numbers = #tpu.dot_dimension_numbers<[1], [0], [0], [1], [0, 0, 1, 1], [], []>} : vector<6x32xbf16>, vector<32x64xbf16>, vector<6x64xf32> -> vector<6x64xf32>
      %c0_110 = arith.constant 0 : index
      %c0_111 = arith.constant 0 : index
      %203 = vector.load %arg21[%c0_110, %c0_111] : memref<1x64xf32, #tpu.memory_space<vmem>>, vector<1x64xf32>
      %204 = vector.broadcast %203 : vector<1x64xf32> to vector<6x64xf32>
      %205 = arith.addf %202, %204 : vector<6x64xf32>
      %c0_112 = arith.constant 0 : index
      %c0_113 = arith.constant 0 : index
      %206 = vector.load %arg27[%c0_112, %c0_113] : memref<6x64xf32, #tpu.memory_space<vmem>>, vector<6x64xf32>
      tpu.vector_store %arg27[%c0_112, %c0_113], %205 {strides = array<i32>} : memref<6x64xf32, #tpu.memory_space<vmem>>, vector<6x64xf32>,
      %207 = vector.shape_cast %143 : vector<16x32xf32> to vector<2x8x32xf32>
      %208 = vector.extract_strided_slice %207 {offsets = [0, 0, 0], sizes = [2, 1, 32], strides = [1, 1, 1]} : vector<2x8x32xf32> to vector<2x1x32xf32>
      %209 = vector.shape_cast %208 : vector<2x1x32xf32> to vector<2x32xf32>
      %210 = arith.truncf %209 : vector<2x32xf32> to vector<2x32xbf16>
      %c0_114 = arith.constant 0 : index
      %c0_115 = arith.constant 0 : index
      %211 = vector.load %arg22[%c0_114, %c0_115] : memref<32x32xbf16, #tpu.memory_space<vmem>>, vector<32x32xbf16>
      %cst_116 = arith.constant dense<0.000000e+00> : vector<2x32xf32>
      %212 = tpu.matmul %210, %211, %cst_116 {dimension_numbers = #tpu.dot_dimension_numbers<[1], [0], [0], [1], [0, 0, 1, 1], [], []>} : vector<2x32xbf16>, vector<32x32xbf16>, vector<2x32xf32> -> vector<2x32xf32>
      %c0_117 = arith.constant 0 : index
      %c0_118 = arith.constant 0 : index
      %213 = vector.load %arg23[%c0_117, %c0_118] : memref<1x32xf32, #tpu.memory_space<vmem>>, vector<1x32xf32>
      %214 = vector.broadcast %213 : vector<1x32xf32> to vector<2x32xf32>
      %215 = arith.addf %212, %214 : vector<2x32xf32>
      %216 = math.tanh %215 : vector<2x32xf32>
      %217 = arith.truncf %216 : vector<2x32xf32> to vector<2x32xbf16>
      %c0_119 = arith.constant 0 : index
      %c0_120 = arith.constant 0 : index
      %218 = vector.load %arg24[%c0_119, %c0_120] : memref<32x2xbf16, #tpu.memory_space<vmem>>, vector<32x2xbf16>
      %cst_121 = arith.constant dense<0.000000e+00> : vector<2x2xf32>
      %219 = tpu.matmul %217, %218, %cst_121 {dimension_numbers = #tpu.dot_dimension_numbers<[1], [0], [0], [1], [0, 0, 1, 1], [], []>} : vector<2x32xbf16>, vector<32x2xbf16>, vector<2x2xf32> -> vector<2x2xf32>
      %c0_122 = arith.constant 0 : index
      %c0_123 = arith.constant 0 : index
      %220 = vector.load %arg25[%c0_122, %c0_123] : memref<1x2xf32, #tpu.memory_space<vmem>>, vector<1x2xf32>
      %221 = vector.broadcast %220 : vector<1x2xf32> to vector<2x2xf32>
      %222 = arith.addf %219, %221 : vector<2x2xf32>
      %c0_124 = arith.constant 0 : index
      %c0_125 = arith.constant 0 : index
      %223 = vector.load %arg28[%c0_124, %c0_125] : memref<2x2xf32, #tpu.memory_space<vmem>>, vector<2x2xf32>
      tpu.vector_store %arg28[%c0_124, %c0_125], %222 {strides = array<i32>} : memref<2x2xf32, #tpu.memory_space<vmem>>, vector<2x2xf32>,
    } else {
    }
    return
  }
  func.func @transform_0(%arg0: i32, %arg1: memref<6xi32, #tpu.memory_space<smem>>) -> (i32, i32) {
    %c0_i32 = arith.constant 0 : i32
    %c0_i32_0 = arith.constant 0 : i32
    %c0_i32_1 = arith.constant 0 : i32
    return %c0_i32, %c0_i32_0 : i32, i32
  }
  func.func @transform_1(%arg0: i32, %arg1: memref<6xi32, #tpu.memory_space<smem>>) -> (i32, i32, i32) {
    %c0_i32 = arith.constant 0 : i32
    %c0_i32_0 = arith.constant 0 : i32
    %c0_i32_1 = arith.constant 0 : i32
    %c0_i32_2 = arith.constant 0 : i32
    return %c0_i32, %c0_i32_0, %c0_i32_1 : i32, i32, i32
  }
  func.func @transform_2(%arg0: i32, %arg1: memref<6xi32, #tpu.memory_space<smem>>) -> (i32, i32, i32, i32) {
    %c0_i32 = arith.constant 0 : i32
    %c0_i32_0 = arith.constant 0 : i32
    %c0_i32_1 = arith.constant 0 : i32
    %c0_i32_2 = arith.constant 0 : i32
    return %arg0, %c0_i32, %c0_i32_0, %c0_i32_1 : i32, i32, i32, i32
  }
  func.func @transform_3(%arg0: i32, %arg1: memref<6xi32, #tpu.memory_space<smem>>) -> (i32, i32, i32, i32) {
    %c0_i32 = arith.constant 0 : i32
    %c0_i32_0 = arith.constant 0 : i32
    %c0_i32_1 = arith.constant 0 : i32
    %c0_i32_2 = arith.constant 0 : i32
    return %arg0, %c0_i32, %c0_i32_0, %c0_i32_1 : i32, i32, i32, i32
  }
  func.func @transform_4(%arg0: i32, %arg1: memref<6xi32, #tpu.memory_space<smem>>) -> (i32, i32, i32) {
    %c0_i32 = arith.constant 0 : i32
    %c0_i32_0 = arith.constant 0 : i32
    %c0_i32_1 = arith.constant 0 : i32
    return %arg0, %c0_i32, %c0_i32_0 : i32, i32, i32
  }
  func.func @transform_5(%arg0: i32, %arg1: memref<6xi32, #tpu.memory_space<smem>>) -> (i32, i32, i32) {
    %c0_i32 = arith.constant 0 : i32
    %c0_i32_0 = arith.constant 0 : i32
    %c0_i32_1 = arith.constant 0 : i32
    return %arg0, %c0_i32, %c0_i32_0 : i32, i32, i32
  }
  func.func @transform_6(%arg0: i32, %arg1: memref<6xi32, #tpu.memory_space<smem>>) -> (i32, i32, i32) {
    %c0_i32 = arith.constant 0 : i32
    %c0_i32_0 = arith.constant 0 : i32
    %c0_i32_1 = arith.constant 0 : i32
    return %arg0, %c0_i32, %c0_i32_0 : i32, i32, i32
  }
  func.func @transform_7(%arg0: i32, %arg1: memref<6xi32, #tpu.memory_space<smem>>) -> (i32, i32, i32) {
    %c0_i32 = arith.constant 0 : i32
    %c0_i32_0 = arith.constant 0 : i32
    %c0_i32_1 = arith.constant 0 : i32
    return %arg0, %c0_i32, %c0_i32_0 : i32, i32, i32
  }
  func.func @transform_8(%arg0: i32, %arg1: memref<6xi32, #tpu.memory_space<smem>>) -> (i32, i32, i32) {
    %c0_i32 = arith.constant 0 : i32
    %c0_i32_0 = arith.constant 0 : i32
    %c0_i32_1 = arith.constant 0 : i32
    return %arg0, %c0_i32, %c0_i32_0 : i32, i32, i32
  }
  func.func @transform_9(%arg0: i32, %arg1: memref<6xi32, #tpu.memory_space<smem>>) -> (i32, i32, i32) {
    %c0_i32 = arith.constant 0 : i32
    %c0_i32_0 = arith.constant 0 : i32
    %c0_i32_1 = arith.constant 0 : i32
    return %arg0, %c0_i32, %c0_i32_0 : i32, i32, i32
  }
  func.func @transform_10(%arg0: i32, %arg1: memref<6xi32, #tpu.memory_space<smem>>) -> (i32, i32, i32) {
    %c0_i32 = arith.constant 0 : i32
    %c0_i32_0 = arith.constant 0 : i32
    %c0_i32_1 = arith.constant 0 : i32
    return %arg0, %c0_i32, %c0_i32_0 : i32, i32, i32
  }
  func.func @transform_11(%arg0: i32, %arg1: memref<6xi32, #tpu.memory_space<smem>>) -> (i32, i32, i32) {
    %c0_i32 = arith.constant 0 : i32
    %c0_i32_0 = arith.constant 0 : i32
    %c0_i32_1 = arith.constant 0 : i32
    return %arg0, %c0_i32, %c0_i32_0 : i32, i32, i32
  }
  func.func @transform_12(%arg0: i32, %arg1: memref<6xi32, #tpu.memory_space<smem>>) -> (i32, i32, i32) {
    %c0_i32 = arith.constant 0 : i32
    %c0_i32_0 = arith.constant 0 : i32
    %c0_i32_1 = arith.constant 0 : i32
    return %arg0, %c0_i32, %c0_i32_0 : i32, i32, i32
  }
  func.func @transform_13(%arg0: i32, %arg1: memref<6xi32, #tpu.memory_space<smem>>) -> (i32, i32, i32) {
    %c0_i32 = arith.constant 0 : i32
    %c0_i32_0 = arith.constant 0 : i32
    %c0_i32_1 = arith.constant 0 : i32
    return %arg0, %c0_i32, %c0_i32_0 : i32, i32, i32
  }
  func.func @transform_14(%arg0: i32, %arg1: memref<6xi32, #tpu.memory_space<smem>>) -> (i32, i32) {
    %c0_i32 = arith.constant 0 : i32
    %c0_i32_0 = arith.constant 0 : i32
    %c0_i32_1 = arith.constant 0 : i32
    return %c0_i32, %c0_i32_0 : i32, i32
  }
  func.func @transform_15(%arg0: i32, %arg1: memref<6xi32, #tpu.memory_space<smem>>) -> (i32, i32) {
    %c0_i32 = arith.constant 0 : i32
    %c0_i32_0 = arith.constant 0 : i32
    %c0_i32_1 = arith.constant 0 : i32
    return %c0_i32, %c0_i32_0 : i32, i32
  }
  func.func @transform_16(%arg0: i32, %arg1: memref<6xi32, #tpu.memory_space<smem>>) -> (i32, i32) {
    %c0_i32 = arith.constant 0 : i32
    %c0_i32_0 = arith.constant 0 : i32
    %c0_i32_1 = arith.constant 0 : i32
    return %c0_i32, %c0_i32_0 : i32, i32
  }
  func.func @transform_17(%arg0: i32, %arg1: memref<6xi32, #tpu.memory_space<smem>>) -> (i32, i32) {
    %c0_i32 = arith.constant 0 : i32
    %c0_i32_0 = arith.constant 0 : i32
    %c0_i32_1 = arith.constant 0 : i32
    return %c0_i32, %c0_i32_0 : i32, i32
  }
  func.func @transform_18(%arg0: i32, %arg1: memref<6xi32, #tpu.memory_space<smem>>) -> (i32, i32) {
    %c0_i32 = arith.constant 0 : i32
    %c0_i32_0 = arith.constant 0 : i32
    %c0_i32_1 = arith.constant 0 : i32
    return %c0_i32, %c0_i32_0 : i32, i32
  }
  func.func @transform_19(%arg0: i32, %arg1: memref<6xi32, #tpu.memory_space<smem>>) -> (i32, i32) {
    %c0_i32 = arith.constant 0 : i32
    %c0_i32_0 = arith.constant 0 : i32
    %c0_i32_1 = arith.constant 0 : i32
    return %c0_i32, %c0_i32_0 : i32, i32
  }
  func.func @transform_20(%arg0: i32, %arg1: memref<6xi32, #tpu.memory_space<smem>>) -> (i32, i32) {
    %c0_i32 = arith.constant 0 : i32
    %c0_i32_0 = arith.constant 0 : i32
    %c0_i32_1 = arith.constant 0 : i32
    return %c0_i32, %c0_i32_0 : i32, i32
  }
  func.func @transform_21(%arg0: i32, %arg1: memref<6xi32, #tpu.memory_space<smem>>) -> (i32, i32) {
    %c0_i32 = arith.constant 0 : i32
    %c0_i32_0 = arith.constant 0 : i32
    %c0_i32_1 = arith.constant 0 : i32
    return %c0_i32, %c0_i32_0 : i32, i32
  }
  func.func @transform_22(%arg0: i32, %arg1: memref<6xi32, #tpu.memory_space<smem>>) -> (i32, i32) {
    %c0_i32 = arith.constant 0 : i32
    %c0_i32_0 = arith.constant 0 : i32
    %c0_i32_1 = arith.constant 0 : i32
    return %c0_i32, %c0_i32_0 : i32, i32
  }
  func.func @transform_23(%arg0: i32, %arg1: memref<6xi32, #tpu.memory_space<smem>>) -> (i32, i32) {
    %c0_i32 = arith.constant 0 : i32
    %c0_i32_0 = arith.constant 0 : i32
    %c0_i32_1 = arith.constant 0 : i32
    return %c0_i32, %c0_i32_0 : i32, i32
  }
  func.func @transform_24(%arg0: i32, %arg1: memref<6xi32, #tpu.memory_space<smem>>) -> (i32, i32) {
    %c0_i32 = arith.constant 0 : i32
    %c0_i32_0 = arith.constant 0 : i32
    %c0_i32_1 = arith.constant 0 : i32
    return %c0_i32, %c0_i32_0 : i32, i32
  }
  func.func @transform_25(%arg0: i32, %arg1: memref<6xi32, #tpu.memory_space<smem>>) -> (i32, i32) {
    %c0_i32 = arith.constant 0 : i32
    %c0_i32_0 = arith.constant 0 : i32
    %c0_i32_1 = arith.constant 0 : i32
    return %c0_i32, %c0_i32_0 : i32, i32
  }
  func.func @transform_26(%arg0: i32, %arg1: memref<6xi32, #tpu.memory_space<smem>>) -> (i32, i32) {
    %c0_i32 = arith.constant 0 : i32
    %c0_i32_0 = arith.constant 0 : i32
    %c0_i32_1 = arith.constant 0 : i32
    return %c0_i32, %c0_i32_0 : i32, i32
  }
}

</mosaic_0001>

<bundles_post_ra>
// kernel: bert_forward.1
= control target key start
LH: loop header
LB: loop body
LE: loop exit
PB: predicated region body
PF: predicated region fallthrough
CT: control target
= control target key end

     0   :  { %s2394_s30 = smov [#allocation4]   ;;  %s2828_s0 = inlined_call_operand.vmem [shape: s32[6], index: 0, kind: input, shape index: {}]   ;;  %s2829_s1 = inlined_call_operand.vmem [shape: f32[16,32], index: 1, kind: input, shape index: {}]   ;;  %s2830_s2 = inlined_call_operand.vmem [shape: f32[4,1,8], index: 2, kind: input, shape index: {}]   ;;  %s2831_s3 = inlined_call_operand.vmem [shape: bf16[2,3,32,32], index: 3, kind: input, shape index: {}]   ;;  %s2832_s4 = inlined_call_operand.vmem [shape: f32[2,3,1,32], index: 4, kind: input, shape index: {}]   ;;  %s2833_s5 = inlined_call_operand.vmem [shape: bf16[2,32,32], index: 5, kind: input, shape index: {}]   ;;  %s2834_s6 = inlined_call_operand.vmem [shape: f32[2,1,32], index: 6, kind: input, shape index: {}]   ;;  %s2835_s7 = inlined_call_operand.vmem [shape: f32[2,1,32], index: 7, kind: input, shape index: {}]   ;;  %s2836_s8 = inlined_call_operand.vmem [shape: f32[2,1,32], index: 8, kind: input, shape index: {}]   ;;  %s2837_s9 = inlined_call_operand.vmem [shape: bf16[2,32,64], index: 9, kind: input, shape index: {}]   ;;  %s2838_s10 = inlined_call_operand.vmem [shape: f32[2,1,64], index: 10, kind: input, shape index: {}]   ;;  %s2839_s11 = inlined_call_operand.vmem [shape: bf16[2,64,32], index: 11, kind: input, shape index: {}]   ;;  %s2840_s12 = inlined_call_operand.vmem [shape: f32[2,1,32], index: 12, kind: input, shape index: {}]   ;;  %s2841_s13 = inlined_call_operand.vmem [shape: f32[2,1,32], index: 13, kind: input, shape index: {}]   ;;  %s2842_s14 = inlined_call_operand.vmem [shape: f32[2,1,32], index: 14, kind: input, shape index: {}]   ;;  %s2843_s15 = inlined_call_operand.vmem [shape: bf16[32,32], index: 15, kind: input, shape index: {}]   ;;  %s2844_s16 = inlined_call_operand.vmem [shape: f32[1,32], index: 16, kind: input, shape index: {}]   ;;  %s2845_s17 = inlined_call_operand.vmem [shape: f32[1,32], index: 17, kind: input, shape index: {}]   ;;  %s2846_s18 = inlined_call_operand.vmem [shape: f32[1,32], index: 18, kind: input, shape index: {}]   ;;  %s2847_s19 = inlined_call_operand.vmem [shape: bf16[32,64], index: 19, kind: input, shape index: {}]   ;;  %s2848_s20 = inlined_call_operand.vmem [shape: f32[1,64], index: 20, kind: input, shape index: {}]   ;;  %s2849_s21 = inlined_call_operand.vmem [shape: bf16[32,32], index: 21, kind: input, shape index: {}]   ;;  %s2850_s22 = inlined_call_operand.vmem [shape: f32[1,32], index: 22, kind: input, shape index: {}]   ;;  %s2851_s23 = inlined_call_operand.vmem [shape: bf16[32,2], index: 23, kind: input, shape index: {}]   ;;  %s2852_s24 = inlined_call_operand.vmem [shape: f32[1,2], index: 24, kind: input, shape index: {}]   ;;  %s2853_s25 = inlined_call_operand.hbm [shape: f32[16,32], index: 25, kind: output, shape index: {0}]   ;;  %s2854_s26 = inlined_call_operand.vmem [shape: f32[6,64], index: 26, kind: output, shape index: {1}]   ;;  %s2855_s27 = inlined_call_operand.hbm [shape: f32[2,2], index: 27, kind: output, shape index: {2}]  }
   0x1   :  { %2862 = sst [smem:[#allocation13_spill]] %s2828_s0 }
   0x2   :  { %2863 = sst [smem:[#allocation14_spill]] %s2829_s1 }
   0x3   :  { %2864 = sst [smem:[#allocation15_spill]] %s2830_s2 }
   0x4   :  { %2865 = sst [smem:[#allocation16_spill]] %s2831_s3 }
   0x5   :  { %2866 = sst [smem:[#allocation17_spill]] %s2832_s4 }
   0x6   :  { %2867 = sst [smem:[#allocation18_spill]] %s2833_s5 }
   0x7   :  { %2868 = sst [smem:[#allocation19_spill]] %s2834_s6 }
   0x8   :  { %2869 = sst [smem:[#allocation20_spill]] %s2835_s7 }
   0x9   :  { %2870 = sst [smem:[#allocation21_spill]] %s2836_s8 }
   0xa   :  { %2871 = sst [smem:[#allocation22_spill]] %s2837_s9 }
   0xb   :  { %2872 = sst [smem:[#allocation23_spill]] %s2838_s10 }
   0xc   :  { %2873 = sst [smem:[#allocation24_spill]] %s2839_s11 }
   0xd   :  { %2874 = sst [smem:[#allocation25_spill]] %s2844_s16 }
   0xe   :  { %2875 = sst [smem:[#allocation26_spill]] %s2845_s17 }
   0xf   :  { %2876 = sst [smem:[#allocation27_spill]] %s2846_s18 }
  0x10   :  { %2877 = sst [smem:[#allocation28_spill]] %s2847_s19 }
  0x11   :  { %2878 = sst [smem:[#allocation29_spill]] %s2848_s20 }
  0x12   :  { %2879 = sst [smem:[#allocation30_spill]] %s2849_s21 }
  0x13   :  { %2880 = sst [smem:[#allocation31_spill]] %s2850_s22 }
  0x14   :  { %2881 = sst [smem:[#allocation32_spill]] %s2851_s23 }
  0x15   :  { %2882 = sst [smem:[#allocation33_spill]] %s2852_s24 }
  0x16   :  { %2883 = sst [smem:[#allocation34_spill]] %s2853_s25 }
  0x17   :  { %2884 = sst [smem:[#allocation35_spill]] %s2854_s26 }
  0x18   :  { %2885 = sst [smem:[#allocation36_spill]] %s2855_s27 }
  0x19   :  { %s2886_s8 = sld [smem:[#allocation13_spill]] }
  0x1f   :  { %s34_s20 = sshll.u32 %s2886_s8, 4  ;;  %s35_s20 = int_to_ptr.vmem [resolvable:$true] %s34_s20 }
  0x20   :  { %37 = dma.vmem_to_smem %s35_s20, 16, %s2394_s30, [#allocation3] }
  0x21   :  { %2380 = dma.done.wait [#allocation3], 16 }
  0x22   :  { %2381 = vsyncadd [#allocation3], 4294967280 }
  0x23   :  { %40 = sfence }
  0x24   :  { %41 = vsyncpa [#allocation6], 0 }
  0x25   :  { %42 = vsyncpa [#allocation8], 0  ;;  %s2545_s9 = smov 0  }
  0x26 LB: > { %2887 = sst [smem:[#allocation12_spill]] %s2392_s9  ;;  %s2551_s5 = sadd.s32 4294967295, %s2392_s9   ;;  %s2392_s9 = sphi %s2545_s9, %s48_s9  }
  0x27   : > { %p2056_p0 = scmp.ge.s32.totalorder %s2392_s9, 1  ;;  %p808_p1 = scmp.lt.s32.totalorder %s2392_s9, 3 }
  0x29   : > { %p809_p2 = pnand %p2056_p0, %p808_p1 }
  0x2a   : > { %p913_p3 = scmp.lt.s32.totalorder (!%p809_p2), %s2551_s5, 1  ;;  %s2888_s6 = sld [smem:[#allocation18_spill]] (!%p809_p2) }
  0x2b   : > { %812 = sbr.rel (%p809_p2) target bundleno = 2512 (0x9d0), region = 116  ;;  %s2889_s7 = sld [smem:[#allocation16_spill]] (!%p809_p2) }
  0x2c   : > { %s2891_s24 = sld [smem:[#allocation17_spill]] (!%p809_p2)  ;;  %p2064_p4 = scmp.ne.s32.totalorder (!%p809_p2), %s2551_s5, 0 }
  0x2d   : > { %s2892_s23 = sld [smem:[#allocation20_spill]] (!%p809_p2) }
  0x2e   : > { %s2893_s22 = sld [smem:[#allocation21_spill]] (!%p809_p2) }
  0x2f   : > { %s2894_s3 = sld [smem:[#allocation22_spill]] (!%p809_p2) }
  0x30   : > { %s2557_s20 = scalar_select %p913_p3, %s2551_s5, 1 }
  0x31   : > { %s2895_s30 = sld [smem:[#allocation23_spill]] }
  0x32   : > { %s2218_s28 = smul.u32 48, %s2557_s20  ;;  %s2193_s0 = sshll.u32 %s2557_s20, 4 }
  0x33   : > { %s2219_s10 = smul.u32 3, %s2557_s20  ;;  %s2565_s11 = scalar_lea.vmem %s2888_s6, %s2193_s0 }
  0x34   : > { %s2570_s4 = scalar_lea.vmem %s2889_s7, %s2218_s28  ;;  %s932_s29 = scalar_lea.vmem %s2892_s23, %s2557_s20 }
  0x35   : > { %s2579_s18 = scalar_lea.vmem %s2891_s24, %s2219_s10  ;;  %s935_s16 = scalar_lea.vmem %s2893_s22, %s2557_s20 }
  0x36   : > { %s2592_s7 = scalar_lea.vmem %s2894_s3, %s2193_s0  ;;  %s2195_s25 = sshll.u32 %s2557_s20, 5 }
  0x37   : > { %s943_s27 = scalar_lea.vmem %s2895_s30, %s2557_s20  ;;  %s2896_s10 = sld [smem:[#allocation24_spill]] }
  0x38   : > { %s951_s23 = scalar_lea.vmem %s2840_s12, %s2557_s20  ;;  %s954_s6 = scalar_lea.vmem %s2841_s13, %s2557_s20 }
  0x39   : > { %s957_s28 = scalar_lea.vmem %s2842_s14, %s2557_s20  ;;  %962 = sbr.rel (%p2064_p4) target bundleno = 67 (0x43), region = 120 }
  0x3a   : > { %s2897_s9 = sld [smem:[#allocation14_spill]] (!%p2064_p4) }
  0x3d   : > { %s2602_s21 = scalar_lea.vmem %s2896_s10, %s2195_s25 }
  0x3e   : > { %vm965_vm0 = vcmask 261120  }
  0x40   : > { %s2898_s30 = smov %s2897_s9  ;;  %v963_v0 = vld [vmem:[%s2897_s9] sm:$0xff] }
  0x41   : > { %v964_v1 = vld [vmem:[%s2898_s30 + $0x8] sm:$0xff]  ;;  %966 = vst.msk [vmem:[#allocation2] sm:$0xff] %vm965_vm0, %v963_v0 }
  0x42   : > { %967 = vst.msk [vmem:[#allocation2 + $0x8] sm:$0xff] %vm965_vm0, %v964_v1 }
  0x43 PF: > { %v2199_v2 = vld [vmem:[%s2570_s4 + $0x18] sm:$0xff]  ;;  %v2198_v3 = vld [vmem:[%s2570_s4 + $0x10] sm:$0xff]  ;;  %v2197_v6 = vld [vmem:[%s2570_s4 + $0x8] sm:$0xff]  ;;  %vm991_vm1 = vcmask 261120   ;;  %vm1117_vm2 = vcmask 130048   ;;  %s2395_s26 = smov 112  }
  0x44   : > { %1037 = vmatpush.bf16.msra.mxu1 %v2199_v2  ;;  %v2196_v7 = vld [vmem:[%s2570_s4] sm:$0xff]  ;;  %1001 = vmatpush.bf16.msra.mxu0 %v2197_v6  ;;  %v2201_v9 = vld [vmem:[%s2570_s4 + $0x28] sm:$0xff]  ;;  %s2899_s17 = sld [smem:[#allocation15_spill]]  ;;  %vm1218_vm3 = vcmask 64512   ;;  %vm1270_vm4 = vcmask 1043456   ;;  %s2396_s3 = smov 16  }
  0x45   : > { %1073 = vmatpush.bf16.msra.mxu2 %v2201_v9  ;;  %v2200_v10 = vld [vmem:[%s2570_s4 + $0x20] sm:$0xff]  ;;  %s2900_s25 = sld [smem:[#allocation19_spill]]  ;;  %vm1534_vm12 = vcmask 523264   ;;  %p2145_p5 = scmp.ne.s32.totalorder %s2551_s5, 1 }
  0x46   : > { %v2258_v11 = vld [vmem:[%s2579_s18 + $0x1] ss:$0 sm:$0xff]  ;;  %v2259_v14 = vld [vmem:[%s2579_s18] ss:$0 sm:$0xff]  ;;  %v2262_v50 = vld [vmem:[%s2579_s18 + $0x2] ss:$0 sm:$0xff] }
  0x47   : > { %s2146_s2 = sld [smem:[#allocation4 + $0x1]] (!%p2145_p5) }
  0x48   : > { %v2625_v4 = vld [vmem:[#allocation2] sm:$0xff]  ;;  %1038 = vmatpush.bf16.msra.mxu1 %v2198_v3  ;;  %1002 = vmatpush.bf16.msra.mxu0 %v2196_v7  ;;  %s2147_s9 = sld [smem:[#allocation4 + $0x2]] (!%p2145_p5) }
  0x49   : > { %v2627_v5 = vld [vmem:[#allocation2 + $0x8] sm:$0xff]  ;;  %1074 = vmatpush.bf16.msra.mxu2 %v2200_v10  ;;  %s2905_s1 = sld [smem:[#allocation30_spill]] (!%p2145_p5) }
  0x4a   : > { %v970_v8 = vpack.c.bf16 %v2627_v5, %v2625_v4  ;;  %v2260_v37 = vld [vmem:[%s2899_s17] ss:$0 sm:$0xff]  ;;  %v2261_v40 = vld [vmem:[%s2899_s17 + $0x1] ss:$0 sm:$0xff]  ;;  %v2263_v59 = vld [vmem:[%s2899_s17 + $0x2] ss:$0 sm:$0xff] }
  0x4b   : > { %v2264_v3 = vld [vmem:[%s2899_s17 + $0x3] ss:$0 sm:$0xff]  ;;  %s2901_s24 = scalar_lea.vmem %s2900_s25, %s2557_s20  ;;  %s2148_s25 = sld [smem:[#allocation4 + $0x3]] (!%p2145_p5) }
  0x4c   : > { %2087 = vmatmul.msk.bf16.vlgmr.msra.gmra.mxu1 %vm991_vm1, %v970_v8  ;;  %2073 = vmatmul.msk.bf16.vlgmr.msra.gmra.mxu0 %vm991_vm1, %v970_v8  ;;  %s2906_s18 = sld [smem:[#allocation25_spill]] (!%p2145_p5) }
  0x4d   : > { %2101 = vmatmul.msk.bf16.vlgmr.msra.gmra.mxu2 %vm991_vm1, %v970_v8  ;;  %s2908_s8 = sld [smem:[#allocation32_spill]] (!%p2145_p5) }
  0x4e   : > { %s1625_s4 = scalar_lea.vmem (!%p2145_p5), [#allocation2], %s2147_s9  ;;  %s2911_s0 = sld [smem:[#allocation27_spill]] (!%p2145_p5) }
  0x51   : > { %s1628_s10 = scalar_lea.vmem (!%p2145_p5), [#allocation2], %s2148_s25 }
  0xc9   : > { %v1040_v12 = vpop.f32.mrf.mxu1  ;;  %v1004_v15 = vpop.f32.mrf.mxu0 }
  0xca   : > { %v1041_v13 = vadd.f32 %v2258_v11, %v1040_v12  ;;  %v1005_v18 = vadd.f32 %v2259_v14, %v1004_v15 }
  0xcc   : > { %1095 = vrot.lane.b32.xlu1 %v1041_v13, %s2395_s26  ;;  %v1101_v16 = vpack.c.bf16 %v1041_v13, %v1041_v13  ;;  %v1089_v20 = vpack.c.bf16 %v1005_v18, %v1005_v18 }
  0xce   : > { %v1122_v17 = vsel %vm1117_vm2, %v1101_v16, 0 }
  0xcf   : > { %1131 = vmatpush.bf16.xpose.msra.mxu3 %v1122_v17 }
  0xd0   : > { %v1076_v49 = vpop.f32.mrf.mxu2 }
  0xd1   : > { %v1042_v19 = vpop.f32.mrf.mxu1  ;;  %v1006_v23 = vpop.f32.mrf.mxu0  ;;  %v1077_v51 = vadd.f32 %v2262_v50, %v1076_v49 }
  0xd2   : > { %v1043_v21 = vadd.f32 %v2258_v11, %v1042_v19  ;;  %v1007_v25 = vadd.f32 %v2259_v14, %v1006_v23 }
  0xd3   : > { %v1113_v56 = vpack.c.bf16 %v1077_v51, %v1077_v51 }
  0xd4   : > { %1097 = vrot.lane.b32.xlu0 %v1043_v21, %s2395_s26  ;;  %1083 = vrot.lane.b32.xlu1 %v1005_v18, %s2395_s26  ;;  %v1102_v22 = vpack.c.bf16 %v1043_v21, %v1043_v21  ;;  %v1090_v26 = vpack.c.bf16 %v1007_v25, %v1007_v25 }
  0xd5   : > { %v1272_v57 = vsel %vm1270_vm4, %v1113_v56, 0  ;;  %v2203_v56 = vld [vmem:[%s2565_s11 + $0x8] sm:$0xff] }
  0xd6   : > { %2102 = vmatmul.msk.bf16.vlgmr.msra.gmra.mxu3 %vm1117_vm2, %v1089_v20  ;;  %v1141_v24 = vsel %vm1117_vm2, %v1102_v22, 0 }
  0xd7   : > { %1150 = vmatpush.bf16.xpose.msrb.mxu0 %v1141_v24  ;;  %1281 = vmatpush.bf16.msrb.mxu3 %v1272_v57 }
  0xd8   : > { %v1078_v52 = vpop.f32.mrf.mxu2 }
  0xd9   : > { %v1079_v53 = vadd.f32 %v2262_v50, %v1078_v52 }
  0xdb   : > { %v1114_v54 = vpack.c.bf16 %v1079_v53, %v1079_v53  ;;  %v2248_v55 = vpack.i.bf16 %v1077_v51, %v1079_v53  ;;  %1384 = vmatpush.bf16.msra.mxu3 %v2203_v56 }
  0xdc   : > { %1085 = vrot.lane.b32.xlu0 %v1007_v25, %s2395_s26 }
  0xdd   : > { %v1291_v58 = vsel %vm1270_vm4, %v1114_v54, 0 }
  0xde   : > { %2103 = vmatmul.msk.bf16.vlgmr.msrb.gmra.mxu0 %vm1117_vm2, %v1090_v26 }
  0xdf   : > { %1300 = vmatpush.bf16.msra.mxu0 %v1291_v58 }
 0x13e   : > { %v1096_v27 = vpop.permute.xlu1 %1095 }
 0x13f   : > { %v1103_v28 = vpack.c.bf16 %v1096_v27, %v1096_v27 }
 0x141   : > { %v1160_v29 = vsel %vm1117_vm2, %v1103_v28, 0 }
 0x142   : > { %1169 = vmatpush.bf16.xpose.msrb.mxu1 %v1160_v29 }
 0x146   : > { %v1098_v30 = vpop.permute.xlu0 %1097  ;;  %v1084_v31 = vpop.permute.xlu1 %1083 }
 0x147   : > { %v1104_v32 = vpack.c.bf16 %v1098_v30, %v1098_v30  ;;  %v1091_v33 = vpack.c.bf16 %v1084_v31, %v1084_v31 }
 0x149   : > { %2104 = vmatmul.msk.bf16.vlgmr.msrb.gmra.mxu1 %vm1117_vm2, %v1091_v33  ;;  %v1179_v34 = vsel %vm1117_vm2, %v1104_v32, 0 }
 0x14a   : > { %1188 = vmatpush.bf16.xpose.msrb.mxu2 %v1179_v34 }
 0x14e   : > { %v1086_v35 = vpop.permute.xlu0 %1085 }
 0x14f   : > { %v1092_v36 = vpack.c.bf16 %v1086_v35, %v1086_v35 }
 0x151   : > { %2105 = vmatmul.msk.bf16.vlgmr.msrb.gmra.mxu2 %vm1117_vm2, %v1092_v36 }
 0x159   : > { %v1133_v38 = vpop.f32.mrf.mxu3 }
 0x15a   : > { %v1194_v39 = vmul.f32 0.25, %v1133_v38 }
 0x15b   : > { %v1152_v41 = vpop.f32.mrf.mxu0 }
 0x15c   : > { %v1195_v42 = vmul.f32 0.25, %v1152_v41  ;;  %v1214_v43 = vadd.f32 %v2260_v37, %v1194_v39 }
 0x15e   : > { %v1219_v44 = vsel %vm1218_vm3, %v1214_v43, -inf  ;;  %v1215_v45 = vadd.f32 %v2261_v40, %v1195_v42 }
 0x15f   : > { %1220 = vmax.xlane.f32.xlu0 %v1219_v44 }
 0x160   : > { %v1222_v46 = vsel %vm1218_vm3, %v1215_v45, -inf }
 0x161   : > { %1223 = vmax.xlane.f32.xlu1 %v1222_v46  ;;  %v1135_v47 = vpop.f32.mrf.mxu3 }
 0x163   : > { %v1154_v48 = vpop.f32.mrf.mxu0 }
 0x1c6   : > { %v1171_v60 = vpop.f32.mrf.mxu1 }
 0x1c7   : > { %v1196_v61 = vmul.f32 0.25, %v1171_v60 }
 0x1c9   : > { %v1216_v62 = vadd.f32 %v2263_v59, %v1196_v61 }
 0x1cb   : > { %v1225_v63 = vsel %vm1218_vm3, %v1216_v62, -inf }
 0x1cc   : > { %1226 = vmax.xlane.f32.xlu2 %v1225_v63 }
 0x1ce   : > { %v1173_v0 = vpop.f32.mrf.mxu1 }
 0x1d2   : > { %v1221_v1 = vpop.xlane.xlu0 %1220 }
 0x1d3   : > { %v1231_v2 = vsub.f32 %v1214_v43, %v1221_v1 }
 0x1d4   : > { %v1190_v6 = vpop.f32.mrf.mxu2  ;;  %v1224_v7 = vpop.xlane.xlu1 %1223 }
 0x1d5   : > { %v1235_v8 = vmul.f32 1.442695, %v1231_v2  ;;  %v1197_v9 = vmul.f32 0.25, %v1190_v6  ;;  %v1232_v10 = vsub.f32 %v1215_v45, %v1224_v7  ;;  %v2265_v7 = vld [vmem:[%s2901_s24] ss:$0 sm:$0xff]  ;;  %s2149_s24 = sld [smem:[#allocation4 + $0x4]] (!%p2145_p5) }
 0x1d7   : > { %2272 = vpow2.f32 %v1235_v8  ;;  %v1237_v11 = vmul.f32 1.442695, %v1232_v10  ;;  %v1217_v12 = vadd.f32 %v2264_v3, %v1197_v9 }
 0x1d9   : > { %2274 = vpow2.f32 %v1237_v11  ;;  %v1228_v13 = vsel %vm1218_vm3, %v1217_v12, -inf }
 0x1da   : > { %1229 = vmax.xlane.f32.xlu2 %v1228_v13 }
 0x1db   : > { %s1631_s19 = scalar_lea.vmem (!%p2145_p5), [#allocation2], %s2149_s24 }
 0x1dc   : > { %v1192_v14 = vpop.f32.mrf.mxu2 }
 0x1dd   : > { %v2273_v15 = vpop.eup %2272 }
 0x1de   : > { %v1243_v16 = vsel %vm1218_vm3, %v2273_v15, 0.0 }
 0x1df   : > { %v2275_v17 = vpop.eup %2274  ;;  %1244 = vadd.xlane.f32.xlu0 %v1243_v16  ;;  %v2397_v16 = vmov 32.0  }
 0x1e0   : > { %v1246_v18 = vsel %vm1218_vm3, %v2275_v17, 0.0 }
 0x1e1   : > { %1247 = vadd.xlane.f32.xlu1 %v1246_v18 }
 0x1f2   : > { %2249 = vrot.lane.b32.xlu2 %v2248_v55, %s2395_s26  ;;  %s1622_s26 = scalar_lea.vmem (!%p2145_p5), [#allocation2], %s2146_s2 }
 0x23f   : > { %v1227_v19 = vpop.xlane.xlu2 %1226 }
 0x240   : > { %v1233_v22 = vsub.f32 %v1216_v62, %v1227_v19  ;;  %v2202_v62 = vld [vmem:[%s2565_s11] sm:$0xff]  ;;  %s2150_s11 = sld [smem:[#allocation4 + $0x5]] (!%p2145_p5) }
 0x241   : > { %1385 = vmatpush.bf16.msra.mxu3 %v2202_v62  ;;  %v2209_v62 = vld [vmem:[%s2602_s21 + $0x18] sm:$0xff] }
 0x242   : > { %v1239_v25 = vmul.f32 1.442695, %v1233_v22 }
 0x24d   : > { %v1230_v20 = vpop.xlane.xlu2 %1229 }
 0x24e   : > { %v1234_v21 = vsub.f32 %v1217_v12, %v1230_v20 }
 0x250   : > { %v1241_v23 = vmul.f32 1.442695, %v1234_v21 }
 0x252   : > { %2276 = vpow2.f32 %v1241_v23  ;;  %v1245_v24 = vpop.xlane.xlu0 %1244 }
 0x253   : > { %2278 = vrcp.f32 %v1245_v24 }
 0x254   : > { %v1248_v26 = vpop.xlane.xlu1 %1247 }
 0x255   : > { %2280 = vrcp.f32 %v1248_v26  ;;  %v2250_v27 = vpop.permute.xlu2 %2249 }
 0x256   : > { %v2252_v28 = vunpack.i.h.bf16 %v2250_v27  ;;  %v2251_v29 = vunpack.i.l.bf16 %v2250_v27  ;;  %2282 = vpow2.f32 %v1239_v25 }
 0x258   : > { %v2277_v30 = vpop.eup %2276  ;;  %v1115_v31 = vpack.c.bf16 %v2252_v28, %v2252_v28  ;;  %v1116_v32 = vpack.c.bf16 %v2251_v29, %v2251_v29 }
 0x259   : > { %v2279_v33 = vpop.eup %2278  ;;  %v1252_v34 = vsel %vm1218_vm3, %v2277_v30, 0.0 }
 0x25a   : > { %v1259_v35 = vmul.f32 %v2279_v33, %v2273_v15  ;;  %1253 = vadd.xlane.f32.xlu2 %v1252_v34  ;;  %v1310_v36 = vsel %vm1270_vm4, %v1115_v31, 0  ;;  %v1329_v37 = vsel %vm1270_vm4, %v1116_v32, 0  ;;  %v2205_v31 = vld [vmem:[%s2592_s7 + $0x8] sm:$0xff] }
 0x25b   : > { %v2281_v38 = vpop.eup %2280  ;;  %1319 = vmatpush.bf16.msra.mxu1 %v1310_v36  ;;  %1338 = vmatpush.bf16.msra.mxu2 %v1329_v37 }
 0x25c   : > { %v1260_v39 = vmul.f32 %v2281_v38, %v2275_v17  ;;  %v1263_v40 = vpack.c.bf16 %v1259_v35, %v1259_v35  ;;  %v2283_v41 = vpop.eup %2282  ;;  %1487 = vmatpush.bf16.msrb.mxu0 %v2205_v31  ;;  %v2204_v35 = vld [vmem:[%s2592_s7] sm:$0xff] }
 0x25d   : > { %v1249_v43 = vsel %vm1218_vm3, %v2283_v41, 0.0 }
 0x25e   : > { %v1264_v42 = vpack.c.bf16 %v1260_v39, %v1260_v39  ;;  %2106 = vmatmul.msk.bf16.vlgmr.msrb.gmra.mxu3 %vm1218_vm3, %v1263_v40 }
 0x25f   : > { %1542 = vmatpush.bf16.msrb.mxu1 %v2209_v62 }
 0x260   : > { %2107 = vmatmul.msk.bf16.vlgmr.msra.gmra.mxu0 %vm1218_vm3, %v1264_v42 }
 0x261   : > { %1488 = vmatpush.bf16.msrb.mxu0 %v2204_v35 }
 0x262   : > { %1250 = vadd.xlane.f32.xlu2 %v1249_v43 }
 0x2cd   : > { %v1254_v44 = vpop.xlane.xlu2 %1253 }
 0x2ce   : > { %2284 = vrcp.f32 %v1254_v44 }
 0x2d4   : > { %v2285_v45 = vpop.eup %2284 }
 0x2d5   : > { %v1262_v46 = vmul.f32 %v2285_v45, %v2277_v30  ;;  %v1251_v47 = vpop.xlane.xlu2 %1250 }
 0x2d6   : > { %2286 = vrcp.f32 %v1251_v47 }
 0x2d7   : > { %v1266_v48 = vpack.c.bf16 %v1262_v46, %v1262_v46  ;;  %2288 = vrcp.f32 %v2397_v16 }
 0x2d9   : > { %2109 = vmatmul.msk.bf16.vlgmr.msra.gmra.mxu2 %vm1218_vm3, %v1266_v48 }
 0x2dc   : > { %v2287_v49 = vpop.eup %2286 }
 0x2dd   : > { %v1261_v50 = vmul.f32 %v2287_v49, %v2283_v41  ;;  %v1302_v51 = vpop.f32.mrf.mxu0  ;;  %v2289_v17 = vpop.eup %2288 }
 0x2de   : > { %v1403_v18 = vmul.f32 32.0, %v2289_v17  ;;  %vm1407_vm5 = vweird.f32 %v2289_v17 }
 0x2df   : > { %v1265_v52 = vpack.c.bf16 %v1261_v50, %v1261_v50 }
 0x2e0   : > { %v1404_v19 = vsub.f32 1.0, %v1403_v18 }
 0x2e1   : > { %v1283_v53 = vpop.f32.mrf.mxu3  ;;  %2108 = vmatmul.msk.bf16.vlgmr.msra.gmra.mxu1 %vm1218_vm3, %v1265_v52 }
 0x2e2   : > { %v1405_v20 = vmul.f32 %v2289_v17, %v1404_v19 }
 0x2e4   : > { %v1406_v21 = vadd.f32 %v2289_v17, %v1405_v20 }
 0x2e5   : > { %v1304_v54 = vpop.f32.mrf.mxu0 }
 0x2e9   : > { %v1285_v55 = vpop.f32.mrf.mxu3 }
 0x2ea   : > { %v2267_v55 = vld [vmem:[%s935_s16] ss:$0 sm:$0xff]  ;;  %s1634_s16 = scalar_lea.vmem (!%p2145_p5), [#allocation2], %s2150_s11 }
 0x35c   : > { %v1340_v57 = vpop.f32.mrf.mxu2 }
 0x35e   : > { %v1321_v58 = vpop.f32.mrf.mxu1 }
 0x35f   : > { %v2253_v59 = vpack.i.bf16 %v1340_v57, %v1321_v58 }
 0x361   : > { %2254 = vrot.lane.b32.xlu0 %v2253_v59, %s2396_s3  ;;  %s2914_s3 = sld [smem:[#allocation35_spill]] (!%p2145_p5) }
 0x364   : > { %v1342_v60 = vpop.f32.mrf.mxu2 }
 0x366   : > { %v1323_v61 = vpop.f32.mrf.mxu1 }
 0x3d3   : > { %v2255_v63 = vpop.permute.xlu0 %2254 }
 0x3d4   : > { %v2257_v0 = vunpack.i.h.bf16 %v2255_v63  ;;  %v2256_v1 = vunpack.i.l.bf16 %v2255_v63  ;;  %v2208_v63 = vld [vmem:[%s2602_s21 + $0x10] sm:$0xff] }
 0x3d5   : > { %1543 = vmatpush.bf16.msrb.mxu1 %v2208_v63 }
 0x3d6   : > { %v1353_v2 = vsel %vm1117_vm2, %v1302_v51, %v2257_v0  ;;  %v1352_v3 = vsel %vm1117_vm2, %v1283_v53, %v2256_v1  ;;  %v2266_v51 = vld [vmem:[%s932_s29] ss:$0 sm:$0xff]  ;;  %v2207_v0 = vld [vmem:[%s2602_s21 + $0x8] sm:$0xff] }
 0x3d7   : > { %v1354_v6 = vpack.c.bf16 %v1353_v2, %v1352_v3  ;;  %v2206_v1 = vld [vmem:[%s2602_s21] sm:$0xff] }
 0x3d8   : > { %v2268_v3 = vld [vmem:[%s943_s27] ss:$0 sm:$0xff] }
 0x3d9   : > { %2118 = vmatmul.msk.bf16.vlgmr.msra.gmra.mxu3 %vm991_vm1, %v1354_v6  ;;  %1544 = vmatpush.bf16.msrb.mxu1 %v2207_v0 }
 0x3dd   : > { %1545 = vmatpush.bf16.msrb.mxu1 %v2206_v1 }
 0x45c   : > { %v1387_v8 = vpop.f32.mrf.mxu3 }
 0x45d   : > { %v1388_v9 = vadd.f32 %v2265_v7, %v1387_v8 }
 0x45f   : > { %v1392_v10 = vadd.f32 %v1388_v9, %v2625_v4  ;;  %v2696_v4 = vsel %vm1407_vm5, %v2289_v17, %v1406_v21 }
 0x461   : > { %v1396_v11 = vsel %vm991_vm1, %v1392_v10, 0.0 }
 0x462   : > { %1397 = vadd.xlane.f32.xlu1 %v1396_v11 }
 0x464   : > { %v1389_v12 = vpop.f32.mrf.mxu3 }
 0x465   : > { %v1390_v13 = vadd.f32 %v2265_v7, %v1389_v12  ;;  %v2269_v12 = vld [vmem:[%s951_s23] ss:$0 sm:$0xff]  ;;  %s2912_s23 = sld [smem:[#allocation33_spill]] (!%p2145_p5) }
 0x467   : > { %v1393_v14 = vadd.f32 %v1390_v13, %v2627_v5 }
 0x469   : > { %v1399_v15 = vsel %vm991_vm1, %v1393_v14, 0.0 }
 0x46a   : > { %1400 = vadd.xlane.f32.xlu1 %v1399_v15 }
 0x4d5   : > { %v1398_v22 = vpop.xlane.xlu1 %1397 }
 0x4d6   : > { %v1409_v23 = vmul.f32 %v2696_v4, %v1398_v22 }
 0x4d8   : > { %v1411_v24 = vsub.f32 %v1392_v10, %v1409_v23 }
 0x4da   : > { %v1413_v5 = vmul.f32 %v1411_v24, %v1411_v24 }
 0x4dc   : > { %v1415_v25 = vsel %vm991_vm1, %v1413_v5, 0.0 }
 0x4dd   : > { %1416 = vadd.xlane.f32.xlu1 %v1415_v25  ;;  %v1401_v26 = vpop.xlane.xlu1 %1400 }
 0x4de   : > { %v1410_v27 = vmul.f32 %v2696_v4, %v1401_v26 }
 0x4e0   : > { %v1412_v28 = vsub.f32 %v1393_v14, %v1410_v27 }
 0x4e2   : > { %v1414_v29 = vmul.f32 %v1412_v28, %v1412_v28 }
 0x4e4   : > { %v1418_v30 = vsel %vm991_vm1, %v1414_v29, 0.0 }
 0x4e5   : > { %1419 = vadd.xlane.f32.xlu0 %v1418_v30 }
 0x550   : > { %v1417_v32 = vpop.xlane.xlu1 %1416 }
 0x551   : > { %v1421_v33 = vmul.f32 %v1417_v32, %v2696_v4 }
 0x553   : > { %v1423_v34 = vadd.f32 1e-05, %v1421_v33 }
 0x555   : > { %2290 = vrsqrt.f32 %v1423_v34  ;;  %vm1431_vm7 = vweird.f32 %v1423_v34 }
 0x558   : > { %v1420_v36 = vpop.xlane.xlu0 %1419 }
 0x559   : > { %v1422_v37 = vmul.f32 %v1420_v36, %v2696_v4 }
 0x55b   : > { %v2291_v38 = vpop.eup %2290  ;;  %v1424_v39 = vadd.f32 1e-05, %v1422_v37 }
 0x55c   : > { %v1426_v40 = vmul.f32 %v2291_v38, %v1423_v34  ;;  %vm1432_vm6 = vweird.f32 %v2291_v38 }
 0x55d   : > { %2292 = vrsqrt.f32 %v1424_v39  ;;  %vm1433_vm8 = vmor %vm1431_vm7, %vm1432_vm6  ;;  %vm1441_vm10 = vweird.f32 %v1424_v39 }
 0x55e   : > { %v1427_v41 = vmul.f32 %v2291_v38, %v1426_v40 }
 0x560   : > { %v1428_v42 = vmul.f32 0.5, %v1427_v41 }
 0x562   : > { %v1429_v43 = vsub.f32 1.5, %v1428_v42 }
 0x563   : > { %v2293_v44 = vpop.eup %2292 }
 0x564   : > { %v1430_v45 = vmul.f32 %v2291_v38, %v1429_v43  ;;  %v1436_v46 = vmul.f32 %v2293_v44, %v1424_v39  ;;  %vm1442_vm9 = vweird.f32 %v2293_v44 }
 0x565   : > { %vm1443_vm11 = vmor %vm1441_vm10, %vm1442_vm9 }
 0x566   : > { %v1437_v47 = vmul.f32 %v2293_v44, %v1436_v46  ;;  %v1434_v48 = vsel %vm1433_vm8, %v2291_v38, %v1430_v45 }
 0x567   : > { %v1445_v52 = vmul.f32 %v1434_v48, %v1411_v24 }
 0x568   : > { %v1438_v49 = vmul.f32 0.5, %v1437_v47  ;;  %v2271_v47 = vld [vmem:[%s957_s28] ss:$0 sm:$0xff]  ;;  %s1618_s28 = sld [smem:[#allocation4]] (!%p2145_p5) }
 0x569   : > { %v1450_v56 = vmul.f32 %v2266_v51, %v1445_v52 }
 0x56a   : > { %v1439_v50 = vsub.f32 1.5, %v1438_v49 }
 0x56b   : > { %v1455_v59 = vadd.f32 %v2267_v55, %v1450_v56 }
 0x56c   : > { %v1440_v53 = vmul.f32 %v2293_v44, %v1439_v50 }
 0x56e   : > { %v1444_v54 = vsel %vm1443_vm11, %v2293_v44, %v1440_v53  ;;  %v2270_v44 = vld [vmem:[%s954_s6] ss:$0 sm:$0xff]  ;;  %s1619_s7 = scalar_lea.vmem (!%p2145_p5), [#allocation2], %s1618_s28  ;;  %s2907_s28 = sld [smem:[#allocation31_spill]] (!%p2145_p5) }
 0x56f   : > { %v1446_v57 = vmul.f32 %v1444_v54, %v1412_v28  ;;  %s2913_s6 = sld [smem:[#allocation29_spill]] (!%p2145_p5) }
 0x571   : > { %v1451_v58 = vmul.f32 %v2266_v51, %v1446_v57 }
 0x573   : > { %v1456_v60 = vadd.f32 %v2267_v55, %v1451_v58 }
 0x575   : > { %v1457_v61 = vpack.c.bf16 %v1456_v60, %v1455_v59 }
 0x577   : > { %2127 = vmatmul.msk.bf16.vlgmr.msrb.gmra.mxu0 %vm991_vm1, %v1457_v61 }
 0x5f4   : > { %v1490_v2 = vpop.f32.mrf.mxu0 }
 0x5f5   : > { %v1491_v6 = vadd.f32 %v2268_v3, %v1490_v2 }
 0x5f7   : > { %v1495_v9 = vmax.f32 %v1491_v6, 0.0 }
 0x5fc   : > { %v1492_v7 = vpop.f32.mrf.mxu0 }
 0x5fd   : > { %v1493_v8 = vadd.f32 %v2268_v3, %v1492_v7 }
 0x5ff   : > { %v1496_v10 = vmax.f32 %v1493_v8, 0.0 }
 0x601   : > { %v1497_v11 = vpack.c.bf16 %v1496_v10, %v1495_v9 }
 0x603   : > { %2144 = vmatmul.msk.bf16.vlgmr.msrb.gmra.mxu1 %vm1534_vm12, %v1497_v11 }
 0x680   : > { %v1547_v13 = vpop.f32.mrf.mxu1 }
 0x681   : > { %v1548_v14 = vadd.f32 %v2269_v12, %v1547_v13 }
 0x683   : > { %v1552_v15 = vadd.f32 %v1548_v14, %v1455_v59 }
 0x685   : > { %v1556_v16 = vsel %vm991_vm1, %v1552_v15, 0.0 }
 0x686   : > { %1557 = vadd.xlane.f32.xlu2 %v1556_v16 }
 0x688   : > { %v1549_v17 = vpop.f32.mrf.mxu1 }
 0x689   : > { %v1550_v18 = vadd.f32 %v2269_v12, %v1549_v17 }
 0x68b   : > { %v1553_v19 = vadd.f32 %v1550_v18, %v1456_v60 }
 0x68d   : > { %v1559_v20 = vsel %vm991_vm1, %v1553_v19, 0.0 }
 0x68e   : > { %1560 = vadd.xlane.f32.xlu1 %v1559_v20 }
 0x6f9   : > { %v1558_v21 = vpop.xlane.xlu2 %1557 }
 0x6fa   : > { %v1562_v22 = vmul.f32 %v1558_v21, %v2696_v4 }
 0x6fc   : > { %v1564_v23 = vsub.f32 %v1552_v15, %v1562_v22 }
 0x6fe   : > { %v1566_v24 = vmul.f32 %v1564_v23, %v1564_v23 }
 0x700   : > { %v1568_v5 = vsel %vm991_vm1, %v1566_v24, 0.0 }
 0x701   : > { %v1561_v25 = vpop.xlane.xlu1 %1560  ;;  %1569 = vadd.xlane.f32.xlu2 %v1568_v5 }
 0x702   : > { %v1563_v26 = vmul.f32 %v1561_v25, %v2696_v4 }
 0x704   : > { %v1565_v27 = vsub.f32 %v1553_v19, %v1563_v26 }
 0x706   : > { %v1567_v28 = vmul.f32 %v1565_v27, %v1565_v27 }
 0x708   : > { %v1571_v29 = vsel %vm991_vm1, %v1567_v28, 0.0 }
 0x709   : > { %1572 = vadd.xlane.f32.xlu1 %v1571_v29 }
 0x774   : > { %v1570_v30 = vpop.xlane.xlu2 %1569 }
 0x775   : > { %v1574_v31 = vmul.f32 %v1570_v30, %v2696_v4 }
 0x777   : > { %v1576_v32 = vadd.f32 1e-05, %v1574_v31 }
 0x779   : > { %2294 = vrsqrt.f32 %v1576_v32  ;;  %vm1584_vm14 = vweird.f32 %v1576_v32 }
 0x77c   : > { %v1573_v33 = vpop.xlane.xlu1 %1572 }
 0x77d   : > { %v1575_v34 = vmul.f32 %v1573_v33, %v2696_v4 }
 0x77f   : > { %v2295_v35 = vpop.eup %2294  ;;  %v1577_v36 = vadd.f32 1e-05, %v1575_v34 }
 0x780   : > { %v1579_v37 = vmul.f32 %v2295_v35, %v1576_v32  ;;  %vm1585_vm13 = vweird.f32 %v2295_v35 }
 0x781   : > { %2296 = vrsqrt.f32 %v1577_v36  ;;  %vm1586_vm15 = vmor %vm1584_vm14, %vm1585_vm13  ;;  %vm1594_vm2 = vweird.f32 %v1577_v36 }
 0x782   : > { %v1580_v38 = vmul.f32 %v2295_v35, %v1579_v37 }
 0x784   : > { %v1581_v39 = vmul.f32 0.5, %v1580_v38 }
 0x786   : > { %v1582_v40 = vsub.f32 1.5, %v1581_v39 }
 0x787   : > { %v2297_v41 = vpop.eup %2296 }
 0x788   : > { %v1583_v42 = vmul.f32 %v2295_v35, %v1582_v40  ;;  %v1589_v43 = vmul.f32 %v2297_v41, %v1577_v36  ;;  %vm1595_vm0 = vweird.f32 %v2297_v41 }
 0x789   : > { %vm1596_vm3 = vmor %vm1594_vm2, %vm1595_vm0 }
 0x78a   : > { %v1587_v45 = vsel %vm1586_vm15, %v2295_v35, %v1583_v42  ;;  %v1590_v46 = vmul.f32 %v2297_v41, %v1589_v43 }
 0x78b   : > { %v1598_v48 = vmul.f32 %v1587_v45, %v1564_v23 }
 0x78c   : > { %v1591_v49 = vmul.f32 0.5, %v1590_v46 }
 0x78d   : > { %v1603_v50 = vmul.f32 %v2270_v44, %v1598_v48 }
 0x78e   : > { %v1592_v51 = vsub.f32 1.5, %v1591_v49 }
 0x78f   : > { %v1608_v52 = vadd.f32 %v2271_v47, %v1603_v50 }
 0x790   : > { %v1593_v53 = vmul.f32 %v2297_v41, %v1592_v51 }
 0x791   : > { %1610 = vst.msk [vmem:[#allocation2] sm:$0xff] %vm991_vm1, %v1608_v52 }
 0x792   : > { %v1597_v54 = vsel %vm1596_vm3, %v2297_v41, %v1593_v53 }
 0x793   : > { %v1599_v55 = vmul.f32 %v1597_v54, %v1565_v27 }
 0x795   : > { %v1604_v56 = vmul.f32 %v2270_v44, %v1599_v55  ;;  %1615 = sbr.rel (%p2145_p5) target bundleno = 2497 (0x9c1), region = 124 }
 0x797   : > { %v1609_v57 = vadd.f32 %v2271_v47, %v1604_v56 }
 0x799   : > { %1611 = vst.msk [vmem:[#allocation2 + $0x8] sm:$0xff] %vm991_vm1, %v1609_v57 }
 0x79a   : > { %1616 = vst.msk [vmem:[#allocation5] sm:$0xff] %vm991_vm1, %v1608_v52  ;;  %v2211_v58 = vld [vmem:[%s2843_s15 + $0x8] sm:$0xff]  ;;  %v2210_v59 = vld [vmem:[%s2843_s15] sm:$0xff]  ;;  %vm1651_vm5 = vcmask 1040384   ;;  %vm1653_vm6 = vcmask 1041408   ;;  %vm1655_vm7 = vcmask 1042432   ;;  %v1770_v16 = vpack.c.bf16 %v1608_v52, %v1608_v52 }
 0x79b   : > { %1617 = vst.msk [vmem:[#allocation5 + $0x8] sm:$0xff] %vm991_vm1, %v1609_v57  ;;  %1690 = vmatpush.bf16.msra.mxu0 %v2211_v58  ;;  %vm1658_vm8 = vcmask 1044480   ;;  %v2215_v15 = vld [vmem:[%s2905_s1 + $0x8] sm:$0xff]  ;;  %v1771_v17 = vpack.c.bf16 %v1609_v57, %v1609_v57  ;;  %v2214_v18 = vld [vmem:[%s2905_s1] sm:$0xff]  ;;  %vm1785_vm9 = vcmask 1041409   ;;  %vm1854_vm13 = vcmask 9216  }
 0x79c   : > { %1809 = vmatpush.bf16.msra.mxu2 %v2215_v15  ;;  %v1782_v19 = vunpack.c.l.b16 %v1770_v16  ;;  %v2298_v24 = vld [vmem:[%s2906_s18] ss:$0 sm:$0xff]  ;;  %v2217_v37 = vld [vmem:[%s2908_s8 + $0x8] sm:$0xff]  ;;  %vm1768_vm14 = vcmask 521216  }
 0x79d   : > { %v1783_v20 = vunpack.c.l.b16 %v1771_v17  ;;  %v2299_v34 = vld [vmem:[%s2907_s28] ss:$0 sm:$0xff]  ;;  %1847 = vmatpush.bf16.msra.mxu3 %v2217_v37 }
 0x79e   : > { %v2216_v38 = vld [vmem:[%s2908_s8] sm:$0xff] }
 0x79f   : > { %1691 = vmatpush.bf16.msra.mxu0 %v2210_v59  ;;  %v1784_v21 = vrot.slane %v1783_v20, 7  ;;  %v2302_v59 = vld [vmem:[%s2912_s23] ss:$0 sm:$0xff] }
 0x7a0   : > { %v1620_v60 = vld [vmem:[%s1619_s7] sm:$0x1]  ;;  %1810 = vmatpush.bf16.msra.mxu2 %v2214_v18  ;;  %s2909_s7 = sld [smem:[#allocation28_spill]] }
 0x7a1   : > { %v1623_v61 = vld [vmem:[%s1622_s26] sm:$0x1]  ;;  %v1786_v22 = vsel %vm1785_vm9, %v1784_v21, %v1782_v19  ;;  %1848 = vmatpush.bf16.msra.mxu3 %v2216_v38 }
 0x7a2   : > { %v1626_v62 = vld [vmem:[%s1625_s4] sm:$0x1]  ;;  %v1637_v63 = vrot.slane %v1623_v61, 7  ;;  %v1787_v23 = vpack.c.b16 %v1786_v22, %v1786_v22 }
 0x7a3   : > { %v1629_v0 = vld [vmem:[%s1628_s10] sm:$0x1]  ;;  %v1640_v1 = vrot.slane %v1626_v62, 6 }
 0x7a4   : > { %v1632_v2 = vld [vmem:[%s1631_s19] sm:$0x1]  ;;  %v1643_v3 = vrot.slane %v1629_v0, 5  ;;  %v1652_v6 = vsel %vm1651_vm5, %v1620_v60, %v1637_v63  ;;  %2177 = vmatmul.msk.bf16.vlgmr.msra.gmra.mxu2 %vm991_vm1, %v1787_v23 }
 0x7a5   : > { %v1635_v7 = vld [vmem:[%s1634_s16] sm:$0x1]  ;;  %v1646_v8 = vrot.slane %v1632_v2, 4  ;;  %v1654_v9 = vsel %vm1653_vm6, %v1652_v6, %v1640_v1  ;;  %s2910_s16 = sld [smem:[#allocation26_spill]] }
 0x7a6   : > { %v1649_v10 = vrot.slane %v1635_v7, 3  ;;  %v1656_v11 = vsel %vm1655_vm7, %v1654_v9, %v1643_v3  ;;  %v2213_v42 = vld [vmem:[%s2909_s7 + $0x8] sm:$0xff]  ;;  %v2212_v43 = vld [vmem:[%s2909_s7] sm:$0xff] }
 0x7a7   : > { %v1657_v12 = vsel %vm1270_vm4, %v1656_v11, %v1646_v8  ;;  %vm1700_vm4 = vcmask 259072   ;;  %1761 = vmatpush.bf16.msra.mxu1 %v2213_v42  ;;  %v2303_v63 = vld [vmem:[%s2913_s6] ss:$0 sm:$0xff] }
 0x7a8   : > { %v1659_v13 = vsel %vm1658_vm8, %v1657_v12, %v1649_v10 }
 0x7a9   : > { %v1660_v14 = vpack.c.bf16 %v1659_v13, %v1659_v13 }
 0x7ab   : > { %2159 = vmatmul.msk.bf16.vlgmr.msra.gmra.mxu0 %vm991_vm1, %v1660_v14  ;;  %1762 = vmatpush.bf16.msra.mxu1 %v2212_v43  ;;  %v2300_v53 = vld [vmem:[%s2910_s16] ss:$0 sm:$0xff] }
 0x827   : > { %v1812_v35 = vpop.f32.mrf.mxu2 }
 0x828   : > { %v1693_v5 = vpop.f32.mrf.mxu0  ;;  %v1813_v36 = vadd.f32 %v2299_v34, %v1812_v35 }
 0x829   : > { %v1694_v25 = vadd.f32 %v2298_v24, %v1693_v5 }
 0x82a   : > { %2304 = vtanh.f32 %v1813_v36 }
 0x82b   : > { %v1697_v26 = vmax.f32 %v1694_v25, 0.0 }
 0x82d   : > { %v1701_v27 = vsel %vm1700_vm4, %v1697_v26, 0.0 }
 0x82e   : > { %1702 = vadd.xlane.f32.xlu0 %v1701_v27 }
 0x82f   : > { %v1814_v39 = vpop.f32.mrf.mxu2 }
 0x830   : > { %v1695_v28 = vpop.f32.mrf.mxu0  ;;  %v2305_v40 = vpop.eup %2304 }
 0x831   : > { %v1817_v41 = vpack.c.bf16 %v2305_v40, %v2305_v40 }
 0x833   : > { %2186 = vmatmul.msk.bf16.vlgmr.msra.gmra.mxu3 %vm991_vm1, %v1817_v41 }
 0x8a1   : > { %v1703_v29 = vpop.xlane.xlu0 %1702 }
 0x8a2   : > { %v1704_v30 = vmul.f32 %v1703_v29, %v2696_v4 }
 0x8a4   : > { %v1705_v31 = vsub.f32 %v1697_v26, %v1704_v30 }
 0x8a6   : > { %v1706_v32 = vmul.f32 %v1705_v31, %v1705_v31 }
 0x8a8   : > { %v1707_v33 = vsel %vm1700_vm4, %v1706_v32, 0.0 }
 0x8a9   : > { %1708 = vadd.xlane.f32.xlu0 %v1707_v33 }
 0x8b6   : > { %v1850_v60 = vpop.f32.mrf.mxu3 }
 0x8b7   : > { %v1851_v61 = vadd.f32 %v2302_v59, %v1850_v60 }
 0x8b9   : > { %1855 = vst.msk [vmem:[#allocation7] sm:$0x3] %vm1854_vm13, %v1851_v61 }
 0x8be   : > { %v1852_v62 = vpop.f32.mrf.mxu3 }
 0x91c   : > { %v1709_v44 = vpop.xlane.xlu0 %1708 }
 0x91d   : > { %v1710_v45 = vmul.f32 %v1709_v44, %v2696_v4  ;;  %v2301_v4 = vld [vmem:[%s2911_s0] ss:$0 sm:$0xff] }
 0x91f   : > { %v1711_v46 = vadd.f32 1e-05, %v1710_v45 }
 0x921   : > { %2306 = vrsqrt.f32 %v1711_v46  ;;  %vm1718_vm11 = vweird.f32 %v1711_v46 }
 0x927   : > { %v2307_v47 = vpop.eup %2306 }
 0x928   : > { %v1713_v48 = vmul.f32 %v2307_v47, %v1711_v46  ;;  %vm1719_vm10 = vweird.f32 %v2307_v47 }
 0x929   : > { %vm1720_vm12 = vmor %vm1718_vm11, %vm1719_vm10 }
 0x92a   : > { %v1714_v49 = vmul.f32 %v2307_v47, %v1713_v48 }
 0x92c   : > { %v1715_v50 = vmul.f32 0.5, %v1714_v49 }
 0x92e   : > { %v1716_v51 = vsub.f32 1.5, %v1715_v50 }
 0x930   : > { %v1717_v52 = vmul.f32 %v2307_v47, %v1716_v51 }
 0x932   : > { %v1721_v54 = vsel %vm1720_vm12, %v2307_v47, %v1717_v52 }
 0x933   : > { %v1722_v55 = vmul.f32 %v1721_v54, %v1705_v31 }
 0x935   : > { %v1726_v56 = vmul.f32 %v2300_v53, %v1722_v55 }
 0x937   : > { %v1730_v57 = vadd.f32 %v2301_v4, %v1726_v56 }
 0x939   : > { %v1731_v58 = vpack.c.bf16 %v1730_v57, %v1730_v57 }
 0x93b   : > { %2168 = vmatmul.msk.bf16.vlgmr.msra.gmra.mxu1 %vm991_vm1, %v1731_v58 }
 0x9b8   : > { %v1764_v0 = vpop.f32.mrf.mxu1 }
 0x9b9   : > { %v1765_v1 = vadd.f32 %v2303_v63, %v1764_v0 }
 0x9bb   : > { %1769 = vst.msk [vmem:[%s2914_s3] sm:$0x3f] %vm1768_vm14, %v1765_v1 }
 0x9c0   : > { %v1766_v2 = vpop.f32.mrf.mxu1 }
 0x9c1 PF: > { %p2228_p6 = scmp.eq.s32.totalorder %s2551_s5, 1  ;;  %s2398_s9 = smov [#allocation5]  }
 0x9c2   : > { %s1861_s25 = sshll.u32 %s2398_s9, 4  ;;  %s2915_s26 = sld [smem:[#allocation34_spill]]  ;;  %s1862_s25 = int_to_ptr.vmem [resolvable:$true] %s1861_s25 }
 0x9c3   : > { %s2399_s10 = smov 128   ;;  %s2400_s19 = smov 8  }
 0x9c4   : > { %s2916_s22 = sld [smem:[#allocation36_spill]]  ;;  %s2401_s21 = smov [#allocation7]  }
 0x9c5   : > { %s1879_s27 = sshll.u32 %s2401_s21, 4  ;;  %s1880_s27 = int_to_ptr.vmem [resolvable:$true] %s1879_s27 }
 0x9c8   : > { %s1863_s4 = sshll.u32 %s2915_s26, 4  ;;  %s1864_s4 = int_to_ptr.hbm [resolvable:$true] %s1863_s4 }
 0x9c9   : > { %2221 = dma.vmem_to_hbm [thread:$0]  (%p2228_p6), %s1862_s25, 256, %s1864_s4, [#allocation6], %s2399_s10, %s2399_s10, %s2400_s19  }
 0x9ca   : > { %s1881_s0 = sshll.u32 %s2916_s22, 4  ;;  %s1882_s0 = int_to_ptr.hbm [resolvable:$true] %s1881_s0 }
 0x9cb   : > { %2223 = dma.vmem_to_hbm [thread:$0]  (%p2228_p6), %s1880_s27, 32, %s1882_s0, [#allocation8]  }
 0x9cc   : > { %2383 = dma.done.wait (%p2228_p6), [#allocation6], 256  }
 0x9cd   : > { %2385 = vsyncadd (%p2228_p6), [#allocation6], 4294967040 }
 0x9ce   : > { %2387 = dma.done.wait (%p2228_p6), [#allocation8], 32  }
 0x9cf   : > { %2389 = vsyncadd (%p2228_p6), [#allocation8], 4294967264 }
 0x9d0 PF: > { %s2917_s23 = sld [smem:[#allocation12_spill]] }
 0x9d6   : > { %s48_s9 = sadd.s32 1, %s2917_s23  }
 0x9d7   : > { %p45_p7 = scmp.ge.s32.totalorder %s48_s9, 4  }
 0x9d9   :  { %47 = sbr.rel (!%p45_p7) target bundleno = 38 (0x26), region = 210 }
 0x9de   :  { %1903 = vsyncpa [#allocation6], 1 }
 0x9df   :  { %1905 = vsyncpa [#allocation6 + $0x1], 1 }
 0x9e0   :  { %1906 = vsyncpa [#allocation8], 1 }

</bundles_post_ra>
